<compile_context>
chip_gen: v7x
topology: tpu7x:2x2x1
jax: 0.10.0
libtpu: 0.0.40
codegen_flags: <defaults>
</compile_context>

<pallas_src>
import jax
import jax.numpy as jnp
from jax import lax
from jax.experimental import pallas as pl
from jax.experimental.pallas import tpu as pltpu


def squeeze_block_kernel(x_ref, g_ref, be_ref, w1_ref, b1_ref, w2_ref,
                         a_ref, b2_ref, o_ref):
    C_in, BT, L = x_ref.shape          # x block is channel-major: (C_in, BT, L)
    C_mid = b1_ref.shape[0]

    # Boundary masks along L (lanes), built once and shared by both convs.
    lane = lax.broadcasted_iota(jnp.int32, (1, L), 1)
    not_first = lane != 0              # positions where the "x[l-1]" tap is valid
    not_last = lane != (L - 1)         # positions where the "x[l+1]" tap is valid

    alpha = a_ref[0]                   # PReLU scalar (SMEM)

    # conv2 per-tap accumulators (fused with the per-channel loop below).
    t0 = None
    t1 = None
    t2 = None

    for o in range(C_mid):
        # ---- Conv1d(C_in -> C_mid, k=3, pad=1), output channel o ------------
        # C_in = d_model = 8 is far too small for a useful MXU matmul without a
        # channel<->batch relayout, so the contraction is done as SMEM-scalar
        # VPU MACs over free (BT, L) channel planes (reviewer's fallback path).
        p0 = None                      # tap k=0 partial sum (pairs with x[l-1])
        p1 = None                      # tap k=1 partial sum (pairs with x[l])
        p2 = None                      # tap k=2 partial sum (pairs with x[l+1])
        for c in range(C_in):
            xc = x_ref[c]              # (BT, L) free major-dim view
            k0 = w1_ref[0 * C_mid * C_in + o * C_in + c]
            k1 = w1_ref[1 * C_mid * C_in + o * C_in + c]
            k2 = w1_ref[2 * C_mid * C_in + o * C_in + c]
            p0 = k0 * xc if p0 is None else p0 + k0 * xc
            p1 = k1 * xc if p1 is None else p1 + k1 * xc
            p2 = k2 * xc if p2 is None else p2 + k2 * xc

        # Output-side shifts: h[l] = p0[l-1] + p1[l] + p2[l+1], zero padding.
        h = (jnp.where(not_first, jnp.roll(p0, 1, axis=-1), 0.0)
             + p1
             + jnp.where(not_last, jnp.roll(p2, -1, axis=-1), 0.0)
             + b1_ref[o])

        # ---- LayerNorm over the last dim (L = 256) ---------------------------
        mean = jnp.mean(h, axis=-1, keepdims=True)
        cen = h - mean
        var = jnp.mean(cen * cen, axis=-1, keepdims=True)
        y = cen * lax.rsqrt(var + 1e-5) * g_ref[...] + be_ref[...]

        # ---- PReLU (single shared parameter) ---------------------------------
        y = jnp.where(y > 0, y, alpha * y)

        # ---- Conv1d(C_mid -> 1, k=3, pad=1): fused per-tap accumulation ------
        a0 = w2_ref[0 * C_mid + o]
        a1 = w2_ref[1 * C_mid + o]
        a2 = w2_ref[2 * C_mid + o]
        t0 = a0 * y if t0 is None else t0 + a0 * y
        t1 = a1 * y if t1 is None else t1 + a1 * y
        t2 = a2 * y if t2 is None else t2 + a2 * y

    z = (jnp.where(not_first, jnp.roll(t0, 1, axis=-1), 0.0)
         + t1
         + jnp.where(not_last, jnp.roll(t2, -1, axis=-1), 0.0)
         + b2_ref[0])
    o_ref[...] = z.astype(o_ref.dtype)


def _pick_batch_tile(B):
    """Batch tile BT and grid size nb.

    BT <= 128, sublane-aligned (multiple of 8) unless a single block covers the
    whole batch, and aims for >= 4 grid steps when B is large enough so each
    v7x TensorCore gets at least two pipelined steps of the 'parallel' axis.
    """
    if B <= 8:
        return B, 1
    bt = min(128, -(-B // 4))
    bt = ((bt + 7) // 8) * 8
    if bt >= B:
        return B, 1
    return bt, -(-B // bt)


@jax.jit
def squeeze_block(x, w1, b1, gamma, beta, alpha, w2, b2):
    B, C_in, L = x.shape
    C_mid = w1.shape[0]

    BT, nb = _pick_batch_tile(B)
    B_pad = nb * BT

    # Channel-major input so each input channel is a free (BT, L) plane in-kernel.
    x_t = jnp.transpose(x, (1, 0, 2))                       # (C_in, B, L)
    if B_pad != B:
        x_t = jnp.pad(x_t, ((0, 0), (0, B_pad - B), (0, 0)))

    # Parameter packing (wrapper-side layout plumbing only).
    # All small parameters go to SMEM as flat f32 vectors read as scalars.
    w1_s = jnp.transpose(w1, (2, 0, 1)).reshape(-1).astype(jnp.float32)  # [k, o, c]
    b1_s = b1.reshape(-1).astype(jnp.float32)                            # (C_mid,)
    w2_s = jnp.transpose(w2[0], (1, 0)).reshape(-1).astype(jnp.float32)  # [k, o]
    a_s = jnp.asarray(alpha, jnp.float32).reshape(1)                     # PReLU scalar
    b2_s = b2.reshape(-1).astype(jnp.float32)                            # (1,)
    g_c = gamma.reshape(1, L).astype(jnp.float32)
    be_c = beta.reshape(1, L).astype(jnp.float32)

    out = pl.pallas_call(
        squeeze_block_kernel,
        out_shape=jax.ShapeDtypeStruct((B_pad, L), x.dtype),
        grid=(nb,),
        in_specs=[
            pl.BlockSpec((C_in, BT, L), lambda i: (0, i, 0)),
            pl.BlockSpec((1, L), lambda i: (0, 0)),
            pl.BlockSpec((1, L), lambda i: (0, 0)),
            pl.BlockSpec(memory_space=pltpu.MemorySpace.SMEM),   # w1 (3*C_mid*C_in,)
            pl.BlockSpec(memory_space=pltpu.MemorySpace.SMEM),   # b1 (C_mid,)
            pl.BlockSpec(memory_space=pltpu.MemorySpace.SMEM),   # w2 (3*C_mid,)
            pl.BlockSpec(memory_space=pltpu.MemorySpace.SMEM),   # alpha (1,)
            pl.BlockSpec(memory_space=pltpu.MemorySpace.SMEM),   # b2 (1,)
        ],
        out_specs=pl.BlockSpec((BT, L), lambda i: (i, 0)),
        compiler_params=pltpu.CompilerParams(
            dimension_semantics=("parallel",)),
    )(x_t, g_c, be_c, w1_s, b1_s, w2_s, a_s, b2_s)

    # torch.squeeze of (B, 1, L) -> (B, L) for B > 1 (B == 1 would also drop
    # the batch dim in PyTorch; we always return (B, L)).
    return out[:B] if B_pad != B else out


def reference(x, w1, b1, gamma, beta, alpha, w2, b2):
    """Pure-JAX reference mirroring PyTorch semantics."""
    dn = ("NCH", "OIH", "NCH")
    h = lax.conv_general_dilated(x, w1, window_strides=(1,),
                                 padding=((1, 1),), dimension_numbers=dn)
    h = h + b1[None, :, None]
    mean = jnp.mean(h, axis=-1, keepdims=True)
    var = jnp.mean((h - mean) ** 2, axis=-1, keepdims=True)
    y = (h - mean) / jnp.sqrt(var + 1e-5) * gamma[None, None, :] + beta[None, None, :]
    y = jnp.where(y > 0, y, alpha * y)
    z = lax.conv_general_dilated(y, w2, window_strides=(1,),
                                 padding=((1, 1),), dimension_numbers=dn)
    z = z + b2[None, :, None]
    return jnp.squeeze(z, axis=1)


if __name__ == "__main__":
    d_model = 8
    L = 256                      # fixed by nn.LayerNorm(256)
    C_mid = d_model // 2

    key = jax.random.PRNGKey(0)
    kx, kw1, kb1, kg, kbe, kw2, kb2, kx2 = jax.random.split(key, 8)

    # Deterministic parameter init (shapes from the PyTorch module).
    w1 = 0.2 * jax.random.normal(kw1, (C_mid, d_model, 3), dtype=jnp.float32)
    b1 = 0.1 * jax.random.normal(kb1, (C_mid,), dtype=jnp.float32)
    gamma = 1.0 + 0.05 * jax.random.normal(kg, (L,), dtype=jnp.float32)
    beta = 0.05 * jax.random.normal(kbe, (L,), dtype=jnp.float32)
    alpha = jnp.array(0.25, dtype=jnp.float32)     # PReLU default init
    w2 = 0.2 * jax.random.normal(kw2, (1, C_mid, 3), dtype=jnp.float32)
    b2 = 0.1 * jax.random.normal(kb2, (1,), dtype=jnp.float32)

    # Small case (B = 2): single grid step, block equals full (tiny) batch.
    x = jax.random.normal(kx, (2, d_model, L), dtype=jnp.float32)
    out = jax.block_until_ready(squeeze_block(x, w1, b1, gamma, beta, alpha, w2, b2))
    ref = reference(x, w1, b1, gamma, beta, alpha, w2, b2)
    assert out.shape == (2, L), out.shape
    assert jnp.allclose(out, ref, rtol=1e-4, atol=2e-4), \
        float(jnp.max(jnp.abs(out - ref)))

    # Larger case (B = 200): exercises batch tiling (BT = 56, 4 grid steps),
    # batch padding and the multi-step "parallel" grid.
    x2 = jax.random.normal(kx2, (200, d_model, L), dtype=jnp.float32)
    out2 = jax.block_until_ready(squeeze_block(x2, w1, b1, gamma, beta, alpha, w2, b2))
    ref2 = reference(x2, w1, b1, gamma, beta, alpha, w2, b2)
    assert out2.shape == (200, L), out2.shape
    assert jnp.allclose(out2, ref2, rtol=1e-4, atol=2e-4), \
        float(jnp.max(jnp.abs(out2 - ref2)))

    print("KERNEL_OK")
</pallas_src>

<mosaic_0001>
module attributes {stable_mosaic.version = 11 : i64} {
  func.func @squeeze_block_kernel(%arg0: i32, %arg1: memref<8x2x256xf32, #tpu.memory_space<vmem>>, %arg2: memref<1x256xf32, #tpu.memory_space<vmem>>, %arg3: memref<1x256xf32, #tpu.memory_space<vmem>>, %arg4: memref<96xf32, #tpu.memory_space<smem>>, %arg5: memref<4xf32, #tpu.memory_space<smem>>, %arg6: memref<12xf32, #tpu.memory_space<smem>>, %arg7: memref<1xf32, #tpu.memory_space<smem>>, %arg8: memref<1xf32, #tpu.memory_space<smem>>, %arg9: memref<2x256xf32, #tpu.memory_space<vmem>>) attributes {dimension_semantics = [#tpu.dimension_semantics<parallel>], iteration_bounds = array<i64: 1>, scalar_prefetch = 0 : i64, scratch_operands = 0 : i64, tpu.core_type = #tpu.core_type<tc>, window_params = [{transform_indices = @transform_0, window_bounds = array<i64: 8, 2, 256>}, {pipeline_mode = #tpu.pipeline_mode<synchronous>, transform_indices = @transform_1, window_bounds = array<i64: 1, 256>}, {pipeline_mode = #tpu.pipeline_mode<synchronous>, transform_indices = @transform_2, window_bounds = array<i64: 1, 256>}, {transform_indices = @transform_3, window_bounds = array<i64: 96>}, {transform_indices = @transform_4, window_bounds = array<i64: 4>}, {transform_indices = @transform_5, window_bounds = array<i64: 12>}, {transform_indices = @transform_6, window_bounds = array<i64: 1>}, {transform_indices = @transform_7, window_bounds = array<i64: 1>}, {transform_indices = @transform_8, window_bounds = array<i64: 2, 256>}]} {
    %0 = tpu.iota {dimensions = array<i32: 1>} : vector<1x256xi32>
    %c0_i32 = arith.constant 0 : i32
    %1 = vector.broadcast %c0_i32 : i32 to vector<1x256xi32>
    %2 = arith.cmpi ne, %0, %1 : vector<1x256xi32>
    %c255_i32 = arith.constant 255 : i32
    %3 = vector.broadcast %c255_i32 : i32 to vector<1x256xi32>
    %4 = arith.cmpi ne, %0, %3 : vector<1x256xi32>
    %c0 = arith.constant 0 : index
    %5 = memref.load %arg7[%c0] : memref<1xf32, #tpu.memory_space<smem>>
    %c0_0 = arith.constant 0 : index
    %c0_1 = arith.constant 0 : index
    %c0_2 = arith.constant 0 : index
    %6 = vector.load %arg1[%c0_0, %c0_1, %c0_2] : memref<8x2x256xf32, #tpu.memory_space<vmem>>, vector<1x2x256xf32>
    %7 = vector.shape_cast %6 : vector<1x2x256xf32> to vector<2x256xf32>
    %c0_3 = arith.constant 0 : index
    %8 = memref.load %arg4[%c0_3] : memref<96xf32, #tpu.memory_space<smem>>
    %c32 = arith.constant 32 : index
    %9 = memref.load %arg4[%c32] : memref<96xf32, #tpu.memory_space<smem>>
    %c64 = arith.constant 64 : index
    %10 = memref.load %arg4[%c64] : memref<96xf32, #tpu.memory_space<smem>>
    %11 = vector.broadcast %8 : f32 to vector<2x256xf32>
    %12 = arith.mulf %11, %7 : vector<2x256xf32>
    %13 = vector.broadcast %9 : f32 to vector<2x256xf32>
    %14 = arith.mulf %13, %7 : vector<2x256xf32>
    %15 = vector.broadcast %10 : f32 to vector<2x256xf32>
    %16 = arith.mulf %15, %7 : vector<2x256xf32>
    %c1 = arith.constant 1 : index
    %c0_4 = arith.constant 0 : index
    %c0_5 = arith.constant 0 : index
    %17 = vector.load %arg1[%c1, %c0_4, %c0_5] : memref<8x2x256xf32, #tpu.memory_space<vmem>>, vector<1x2x256xf32>
    %18 = vector.shape_cast %17 : vector<1x2x256xf32> to vector<2x256xf32>
    %c1_6 = arith.constant 1 : index
    %19 = memref.load %arg4[%c1_6] : memref<96xf32, #tpu.memory_space<smem>>
    %c33 = arith.constant 33 : index
    %20 = memref.load %arg4[%c33] : memref<96xf32, #tpu.memory_space<smem>>
    %c65 = arith.constant 65 : index
    %21 = memref.load %arg4[%c65] : memref<96xf32, #tpu.memory_space<smem>>
    %22 = vector.broadcast %19 : f32 to vector<2x256xf32>
    %23 = arith.mulf %22, %18 : vector<2x256xf32>
    %24 = arith.addf %12, %23 : vector<2x256xf32>
    %25 = vector.broadcast %20 : f32 to vector<2x256xf32>
    %26 = arith.mulf %25, %18 : vector<2x256xf32>
    %27 = arith.addf %14, %26 : vector<2x256xf32>
    %28 = vector.broadcast %21 : f32 to vector<2x256xf32>
    %29 = arith.mulf %28, %18 : vector<2x256xf32>
    %30 = arith.addf %16, %29 : vector<2x256xf32>
    %c2 = arith.constant 2 : index
    %c0_7 = arith.constant 0 : index
    %c0_8 = arith.constant 0 : index
    %31 = vector.load %arg1[%c2, %c0_7, %c0_8] : memref<8x2x256xf32, #tpu.memory_space<vmem>>, vector<1x2x256xf32>
    %32 = vector.shape_cast %31 : vector<1x2x256xf32> to vector<2x256xf32>
    %c2_9 = arith.constant 2 : index
    %33 = memref.load %arg4[%c2_9] : memref<96xf32, #tpu.memory_space<smem>>
    %c34 = arith.constant 34 : index
    %34 = memref.load %arg4[%c34] : memref<96xf32, #tpu.memory_space<smem>>
    %c66 = arith.constant 66 : index
    %35 = memref.load %arg4[%c66] : memref<96xf32, #tpu.memory_space<smem>>
    %36 = vector.broadcast %33 : f32 to vector<2x256xf32>
    %37 = arith.mulf %36, %32 : vector<2x256xf32>
    %38 = arith.addf %24, %37 : vector<2x256xf32>
    %39 = vector.broadcast %34 : f32 to vector<2x256xf32>
    %40 = arith.mulf %39, %32 : vector<2x256xf32>
    %41 = arith.addf %27, %40 : vector<2x256xf32>
    %42 = vector.broadcast %35 : f32 to vector<2x256xf32>
    %43 = arith.mulf %42, %32 : vector<2x256xf32>
    %44 = arith.addf %30, %43 : vector<2x256xf32>
    %c3 = arith.constant 3 : index
    %c0_10 = arith.constant 0 : index
    %c0_11 = arith.constant 0 : index
    %45 = vector.load %arg1[%c3, %c0_10, %c0_11] : memref<8x2x256xf32, #tpu.memory_space<vmem>>, vector<1x2x256xf32>
    %46 = vector.shape_cast %45 : vector<1x2x256xf32> to vector<2x256xf32>
    %c3_12 = arith.constant 3 : index
    %47 = memref.load %arg4[%c3_12] : memref<96xf32, #tpu.memory_space<smem>>
    %c35 = arith.constant 35 : index
    %48 = memref.load %arg4[%c35] : memref<96xf32, #tpu.memory_space<smem>>
    %c67 = arith.constant 67 : index
    %49 = memref.load %arg4[%c67] : memref<96xf32, #tpu.memory_space<smem>>
    %50 = vector.broadcast %47 : f32 to vector<2x256xf32>
    %51 = arith.mulf %50, %46 : vector<2x256xf32>
    %52 = arith.addf %38, %51 : vector<2x256xf32>
    %53 = vector.broadcast %48 : f32 to vector<2x256xf32>
    %54 = arith.mulf %53, %46 : vector<2x256xf32>
    %55 = arith.addf %41, %54 : vector<2x256xf32>
    %56 = vector.broadcast %49 : f32 to vector<2x256xf32>
    %57 = arith.mulf %56, %46 : vector<2x256xf32>
    %58 = arith.addf %44, %57 : vector<2x256xf32>
    %c4 = arith.constant 4 : index
    %c0_13 = arith.constant 0 : index
    %c0_14 = arith.constant 0 : index
    %59 = vector.load %arg1[%c4, %c0_13, %c0_14] : memref<8x2x256xf32, #tpu.memory_space<vmem>>, vector<1x2x256xf32>
    %60 = vector.shape_cast %59 : vector<1x2x256xf32> to vector<2x256xf32>
    %c4_15 = arith.constant 4 : index
    %61 = memref.load %arg4[%c4_15] : memref<96xf32, #tpu.memory_space<smem>>
    %c36 = arith.constant 36 : index
    %62 = memref.load %arg4[%c36] : memref<96xf32, #tpu.memory_space<smem>>
    %c68 = arith.constant 68 : index
    %63 = memref.load %arg4[%c68] : memref<96xf32, #tpu.memory_space<smem>>
    %64 = vector.broadcast %61 : f32 to vector<2x256xf32>
    %65 = arith.mulf %64, %60 : vector<2x256xf32>
    %66 = arith.addf %52, %65 : vector<2x256xf32>
    %67 = vector.broadcast %62 : f32 to vector<2x256xf32>
    %68 = arith.mulf %67, %60 : vector<2x256xf32>
    %69 = arith.addf %55, %68 : vector<2x256xf32>
    %70 = vector.broadcast %63 : f32 to vector<2x256xf32>
    %71 = arith.mulf %70, %60 : vector<2x256xf32>
    %72 = arith.addf %58, %71 : vector<2x256xf32>
    %c5 = arith.constant 5 : index
    %c0_16 = arith.constant 0 : index
    %c0_17 = arith.constant 0 : index
    %73 = vector.load %arg1[%c5, %c0_16, %c0_17] : memref<8x2x256xf32, #tpu.memory_space<vmem>>, vector<1x2x256xf32>
    %74 = vector.shape_cast %73 : vector<1x2x256xf32> to vector<2x256xf32>
    %c5_18 = arith.constant 5 : index
    %75 = memref.load %arg4[%c5_18] : memref<96xf32, #tpu.memory_space<smem>>
    %c37 = arith.constant 37 : index
    %76 = memref.load %arg4[%c37] : memref<96xf32, #tpu.memory_space<smem>>
    %c69 = arith.constant 69 : index
    %77 = memref.load %arg4[%c69] : memref<96xf32, #tpu.memory_space<smem>>
    %78 = vector.broadcast %75 : f32 to vector<2x256xf32>
    %79 = arith.mulf %78, %74 : vector<2x256xf32>
    %80 = arith.addf %66, %79 : vector<2x256xf32>
    %81 = vector.broadcast %76 : f32 to vector<2x256xf32>
    %82 = arith.mulf %81, %74 : vector<2x256xf32>
    %83 = arith.addf %69, %82 : vector<2x256xf32>
    %84 = vector.broadcast %77 : f32 to vector<2x256xf32>
    %85 = arith.mulf %84, %74 : vector<2x256xf32>
    %86 = arith.addf %72, %85 : vector<2x256xf32>
    %c6 = arith.constant 6 : index
    %c0_19 = arith.constant 0 : index
    %c0_20 = arith.constant 0 : index
    %87 = vector.load %arg1[%c6, %c0_19, %c0_20] : memref<8x2x256xf32, #tpu.memory_space<vmem>>, vector<1x2x256xf32>
    %88 = vector.shape_cast %87 : vector<1x2x256xf32> to vector<2x256xf32>
    %c6_21 = arith.constant 6 : index
    %89 = memref.load %arg4[%c6_21] : memref<96xf32, #tpu.memory_space<smem>>
    %c38 = arith.constant 38 : index
    %90 = memref.load %arg4[%c38] : memref<96xf32, #tpu.memory_space<smem>>
    %c70 = arith.constant 70 : index
    %91 = memref.load %arg4[%c70] : memref<96xf32, #tpu.memory_space<smem>>
    %92 = vector.broadcast %89 : f32 to vector<2x256xf32>
    %93 = arith.mulf %92, %88 : vector<2x256xf32>
    %94 = arith.addf %80, %93 : vector<2x256xf32>
    %95 = vector.broadcast %90 : f32 to vector<2x256xf32>
    %96 = arith.mulf %95, %88 : vector<2x256xf32>
    %97 = arith.addf %83, %96 : vector<2x256xf32>
    %98 = vector.broadcast %91 : f32 to vector<2x256xf32>
    %99 = arith.mulf %98, %88 : vector<2x256xf32>
    %100 = arith.addf %86, %99 : vector<2x256xf32>
    %c7 = arith.constant 7 : index
    %c0_22 = arith.constant 0 : index
    %c0_23 = arith.constant 0 : index
    %101 = vector.load %arg1[%c7, %c0_22, %c0_23] : memref<8x2x256xf32, #tpu.memory_space<vmem>>, vector<1x2x256xf32>
    %102 = vector.shape_cast %101 : vector<1x2x256xf32> to vector<2x256xf32>
    %c7_24 = arith.constant 7 : index
    %103 = memref.load %arg4[%c7_24] : memref<96xf32, #tpu.memory_space<smem>>
    %c39 = arith.constant 39 : index
    %104 = memref.load %arg4[%c39] : memref<96xf32, #tpu.memory_space<smem>>
    %c71 = arith.constant 71 : index
    %105 = memref.load %arg4[%c71] : memref<96xf32, #tpu.memory_space<smem>>
    %106 = vector.broadcast %103 : f32 to vector<2x256xf32>
    %107 = arith.mulf %106, %102 : vector<2x256xf32>
    %108 = arith.addf %94, %107 : vector<2x256xf32>
    %109 = vector.broadcast %104 : f32 to vector<2x256xf32>
    %110 = arith.mulf %109, %102 : vector<2x256xf32>
    %111 = arith.addf %97, %110 : vector<2x256xf32>
    %112 = vector.broadcast %105 : f32 to vector<2x256xf32>
    %113 = arith.mulf %112, %102 : vector<2x256xf32>
    %114 = arith.addf %100, %113 : vector<2x256xf32>
    %115 = vector.extract_strided_slice %108 {offsets = [0, 255], sizes = [2, 1], strides = [1, 1]} : vector<2x256xf32> to vector<2x1xf32>
    %116 = vector.extract_strided_slice %108 {offsets = [0, 0], sizes = [2, 255], strides = [1, 1]} : vector<2x256xf32> to vector<2x255xf32>
    %117 = tpu.concatenate %115, %116 in 1 : vector<2x1xf32>, vector<2x255xf32> -> vector<2x256xf32>
    %cst = arith.constant 0.000000e+00 : f32
    %118 = vector.shape_cast %2 : vector<1x256xi1> to vector<1x256xi1>
    %119 = vector.broadcast %118 : vector<1x256xi1> to vector<2x256xi1>
    %120 = vector.broadcast %cst : f32 to vector<2x256xf32>
    %121 = arith.select %119, %117, %120 : vector<2x256xi1>, vector<2x256xf32>
    %122 = arith.addf %121, %111 : vector<2x256xf32>
    %123 = vector.extract_strided_slice %114 {offsets = [0, 1], sizes = [2, 255], strides = [1, 1]} : vector<2x256xf32> to vector<2x255xf32>
    %124 = vector.extract_strided_slice %114 {offsets = [0, 0], sizes = [2, 1], strides = [1, 1]} : vector<2x256xf32> to vector<2x1xf32>
    %125 = tpu.concatenate %123, %124 in 1 : vector<2x255xf32>, vector<2x1xf32> -> vector<2x256xf32>
    %cst_25 = arith.constant 0.000000e+00 : f32
    %126 = vector.shape_cast %4 : vector<1x256xi1> to vector<1x256xi1>
    %127 = vector.broadcast %126 : vector<1x256xi1> to vector<2x256xi1>
    %128 = vector.broadcast %cst_25 : f32 to vector<2x256xf32>
    %129 = arith.select %127, %125, %128 : vector<2x256xi1>, vector<2x256xf32>
    %130 = arith.addf %122, %129 : vector<2x256xf32>
    %c0_26 = arith.constant 0 : index
    %131 = memref.load %arg5[%c0_26] : memref<4xf32, #tpu.memory_space<smem>>
    %132 = vector.broadcast %131 : f32 to vector<2x256xf32>
    %133 = arith.addf %130, %132 : vector<2x256xf32>
    %cst_27 = arith.constant dense<0.000000e+00> : vector<2xf32>
    %134 = vector.multi_reduction <add>, %133, %cst_27 [1] : vector<2x256xf32> to vector<2xf32>
    %135 = vector.shape_cast %134 : vector<2xf32> to vector<2x1xf32>
    %cst_28 = arith.constant 2.560000e+02 : f32
    %136 = vector.broadcast %cst_28 : f32 to vector<2x1xf32>
    %137 = arith.divf %135, %136 : vector<2x1xf32>
    %138 = vector.broadcast %137 : vector<2x1xf32> to vector<2x256xf32>
    %139 = arith.subf %133, %138 : vector<2x256xf32>
    %140 = arith.mulf %139, %139 : vector<2x256xf32>
    %cst_29 = arith.constant dense<0.000000e+00> : vector<2xf32>
    %141 = vector.multi_reduction <add>, %140, %cst_29 [1] : vector<2x256xf32> to vector<2xf32>
    %142 = vector.shape_cast %141 : vector<2xf32> to vector<2x1xf32>
    %cst_30 = arith.constant 2.560000e+02 : f32
    %143 = vector.broadcast %cst_30 : f32 to vector<2x1xf32>
    %144 = arith.divf %142, %143 : vector<2x1xf32>
    %cst_31 = arith.constant 9.99999974E-6 : f32
    %145 = vector.broadcast %cst_31 : f32 to vector<2x1xf32>
    %146 = arith.addf %144, %145 : vector<2x1xf32>
    %147 = math.rsqrt %146 : vector<2x1xf32>
    %148 = vector.broadcast %147 : vector<2x1xf32> to vector<2x256xf32>
    %149 = arith.mulf %139, %148 : vector<2x256xf32>
    %c0_32 = arith.constant 0 : index
    %c0_33 = arith.constant 0 : index
    %150 = vector.load %arg2[%c0_32, %c0_33] : memref<1x256xf32, #tpu.memory_space<vmem>>, vector<1x256xf32>
    %151 = vector.broadcast %150 : vector<1x256xf32> to vector<2x256xf32>
    %152 = arith.mulf %149, %151 : vector<2x256xf32>
    %c0_34 = arith.constant 0 : index
    %c0_35 = arith.constant 0 : index
    %153 = vector.load %arg3[%c0_34, %c0_35] : memref<1x256xf32, #tpu.memory_space<vmem>>, vector<1x256xf32>
    %154 = vector.broadcast %153 : vector<1x256xf32> to vector<2x256xf32>
    %155 = arith.addf %152, %154 : vector<2x256xf32>
    %cst_36 = arith.constant 0.000000e+00 : f32
    %156 = vector.broadcast %cst_36 : f32 to vector<2x256xf32>
    %157 = arith.cmpf ogt, %155, %156 : vector<2x256xf32>
    %158 = vector.broadcast %5 : f32 to vector<2x256xf32>
    %159 = arith.mulf %158, %155 : vector<2x256xf32>
    %160 = arith.select %157, %155, %159 : vector<2x256xi1>, vector<2x256xf32>
    %c0_37 = arith.constant 0 : index
    %161 = memref.load %arg6[%c0_37] : memref<12xf32, #tpu.memory_space<smem>>
    %c4_38 = arith.constant 4 : index
    %162 = memref.load %arg6[%c4_38] : memref<12xf32, #tpu.memory_space<smem>>
    %c8 = arith.constant 8 : index
    %163 = memref.load %arg6[%c8] : memref<12xf32, #tpu.memory_space<smem>>
    %164 = vector.broadcast %161 : f32 to vector<2x256xf32>
    %165 = arith.mulf %164, %160 : vector<2x256xf32>
    %166 = vector.broadcast %162 : f32 to vector<2x256xf32>
    %167 = arith.mulf %166, %160 : vector<2x256xf32>
    %168 = vector.broadcast %163 : f32 to vector<2x256xf32>
    %169 = arith.mulf %168, %160 : vector<2x256xf32>
    %c0_39 = arith.constant 0 : index
    %c0_40 = arith.constant 0 : index
    %c0_41 = arith.constant 0 : index
    %170 = vector.load %arg1[%c0_39, %c0_40, %c0_41] : memref<8x2x256xf32, #tpu.memory_space<vmem>>, vector<1x2x256xf32>
    %171 = vector.shape_cast %170 : vector<1x2x256xf32> to vector<2x256xf32>
    %c8_42 = arith.constant 8 : index
    %172 = memref.load %arg4[%c8_42] : memref<96xf32, #tpu.memory_space<smem>>
    %c40 = arith.constant 40 : index
    %173 = memref.load %arg4[%c40] : memref<96xf32, #tpu.memory_space<smem>>
    %c72 = arith.constant 72 : index
    %174 = memref.load %arg4[%c72] : memref<96xf32, #tpu.memory_space<smem>>
    %175 = vector.broadcast %172 : f32 to vector<2x256xf32>
    %176 = arith.mulf %175, %171 : vector<2x256xf32>
    %177 = vector.broadcast %173 : f32 to vector<2x256xf32>
    %178 = arith.mulf %177, %171 : vector<2x256xf32>
    %179 = vector.broadcast %174 : f32 to vector<2x256xf32>
    %180 = arith.mulf %179, %171 : vector<2x256xf32>
    %c1_43 = arith.constant 1 : index
    %c0_44 = arith.constant 0 : index
    %c0_45 = arith.constant 0 : index
    %181 = vector.load %arg1[%c1_43, %c0_44, %c0_45] : memref<8x2x256xf32, #tpu.memory_space<vmem>>, vector<1x2x256xf32>
    %182 = vector.shape_cast %181 : vector<1x2x256xf32> to vector<2x256xf32>
    %c9 = arith.constant 9 : index
    %183 = memref.load %arg4[%c9] : memref<96xf32, #tpu.memory_space<smem>>
    %c41 = arith.constant 41 : index
    %184 = memref.load %arg4[%c41] : memref<96xf32, #tpu.memory_space<smem>>
    %c73 = arith.constant 73 : index
    %185 = memref.load %arg4[%c73] : memref<96xf32, #tpu.memory_space<smem>>
    %186 = vector.broadcast %183 : f32 to vector<2x256xf32>
    %187 = arith.mulf %186, %182 : vector<2x256xf32>
    %188 = arith.addf %176, %187 : vector<2x256xf32>
    %189 = vector.broadcast %184 : f32 to vector<2x256xf32>
    %190 = arith.mulf %189, %182 : vector<2x256xf32>
    %191 = arith.addf %178, %190 : vector<2x256xf32>
    %192 = vector.broadcast %185 : f32 to vector<2x256xf32>
    %193 = arith.mulf %192, %182 : vector<2x256xf32>
    %194 = arith.addf %180, %193 : vector<2x256xf32>
    %c2_46 = arith.constant 2 : index
    %c0_47 = arith.constant 0 : index
    %c0_48 = arith.constant 0 : index
    %195 = vector.load %arg1[%c2_46, %c0_47, %c0_48] : memref<8x2x256xf32, #tpu.memory_space<vmem>>, vector<1x2x256xf32>
    %196 = vector.shape_cast %195 : vector<1x2x256xf32> to vector<2x256xf32>
    %c10 = arith.constant 10 : index
    %197 = memref.load %arg4[%c10] : memref<96xf32, #tpu.memory_space<smem>>
    %c42 = arith.constant 42 : index
    %198 = memref.load %arg4[%c42] : memref<96xf32, #tpu.memory_space<smem>>
    %c74 = arith.constant 74 : index
    %199 = memref.load %arg4[%c74] : memref<96xf32, #tpu.memory_space<smem>>
    %200 = vector.broadcast %197 : f32 to vector<2x256xf32>
    %201 = arith.mulf %200, %196 : vector<2x256xf32>
    %202 = arith.addf %188, %201 : vector<2x256xf32>
    %203 = vector.broadcast %198 : f32 to vector<2x256xf32>
    %204 = arith.mulf %203, %196 : vector<2x256xf32>
    %205 = arith.addf %191, %204 : vector<2x256xf32>
    %206 = vector.broadcast %199 : f32 to vector<2x256xf32>
    %207 = arith.mulf %206, %196 : vector<2x256xf32>
    %208 = arith.addf %194, %207 : vector<2x256xf32>
    %c3_49 = arith.constant 3 : index
    %c0_50 = arith.constant 0 : index
    %c0_51 = arith.constant 0 : index
    %209 = vector.load %arg1[%c3_49, %c0_50, %c0_51] : memref<8x2x256xf32, #tpu.memory_space<vmem>>, vector<1x2x256xf32>
    %210 = vector.shape_cast %209 : vector<1x2x256xf32> to vector<2x256xf32>
    %c11 = arith.constant 11 : index
    %211 = memref.load %arg4[%c11] : memref<96xf32, #tpu.memory_space<smem>>
    %c43 = arith.constant 43 : index
    %212 = memref.load %arg4[%c43] : memref<96xf32, #tpu.memory_space<smem>>
    %c75 = arith.constant 75 : index
    %213 = memref.load %arg4[%c75] : memref<96xf32, #tpu.memory_space<smem>>
    %214 = vector.broadcast %211 : f32 to vector<2x256xf32>
    %215 = arith.mulf %214, %210 : vector<2x256xf32>
    %216 = arith.addf %202, %215 : vector<2x256xf32>
    %217 = vector.broadcast %212 : f32 to vector<2x256xf32>
    %218 = arith.mulf %217, %210 : vector<2x256xf32>
    %219 = arith.addf %205, %218 : vector<2x256xf32>
    %220 = vector.broadcast %213 : f32 to vector<2x256xf32>
    %221 = arith.mulf %220, %210 : vector<2x256xf32>
    %222 = arith.addf %208, %221 : vector<2x256xf32>
    %c4_52 = arith.constant 4 : index
    %c0_53 = arith.constant 0 : index
    %c0_54 = arith.constant 0 : index
    %223 = vector.load %arg1[%c4_52, %c0_53, %c0_54] : memref<8x2x256xf32, #tpu.memory_space<vmem>>, vector<1x2x256xf32>
    %224 = vector.shape_cast %223 : vector<1x2x256xf32> to vector<2x256xf32>
    %c12 = arith.constant 12 : index
    %225 = memref.load %arg4[%c12] : memref<96xf32, #tpu.memory_space<smem>>
    %c44 = arith.constant 44 : index
    %226 = memref.load %arg4[%c44] : memref<96xf32, #tpu.memory_space<smem>>
    %c76 = arith.constant 76 : index
    %227 = memref.load %arg4[%c76] : memref<96xf32, #tpu.memory_space<smem>>
    %228 = vector.broadcast %225 : f32 to vector<2x256xf32>
    %229 = arith.mulf %228, %224 : vector<2x256xf32>
    %230 = arith.addf %216, %229 : vector<2x256xf32>
    %231 = vector.broadcast %226 : f32 to vector<2x256xf32>
    %232 = arith.mulf %231, %224 : vector<2x256xf32>
    %233 = arith.addf %219, %232 : vector<2x256xf32>
    %234 = vector.broadcast %227 : f32 to vector<2x256xf32>
    %235 = arith.mulf %234, %224 : vector<2x256xf32>
    %236 = arith.addf %222, %235 : vector<2x256xf32>
    %c5_55 = arith.constant 5 : index
    %c0_56 = arith.constant 0 : index
    %c0_57 = arith.constant 0 : index
    %237 = vector.load %arg1[%c5_55, %c0_56, %c0_57] : memref<8x2x256xf32, #tpu.memory_space<vmem>>, vector<1x2x256xf32>
    %238 = vector.shape_cast %237 : vector<1x2x256xf32> to vector<2x256xf32>
    %c13 = arith.constant 13 : index
    %239 = memref.load %arg4[%c13] : memref<96xf32, #tpu.memory_space<smem>>
    %c45 = arith.constant 45 : index
    %240 = memref.load %arg4[%c45] : memref<96xf32, #tpu.memory_space<smem>>
    %c77 = arith.constant 77 : index
    %241 = memref.load %arg4[%c77] : memref<96xf32, #tpu.memory_space<smem>>
    %242 = vector.broadcast %239 : f32 to vector<2x256xf32>
    %243 = arith.mulf %242, %238 : vector<2x256xf32>
    %244 = arith.addf %230, %243 : vector<2x256xf32>
    %245 = vector.broadcast %240 : f32 to vector<2x256xf32>
    %246 = arith.mulf %245, %238 : vector<2x256xf32>
    %247 = arith.addf %233, %246 : vector<2x256xf32>
    %248 = vector.broadcast %241 : f32 to vector<2x256xf32>
    %249 = arith.mulf %248, %238 : vector<2x256xf32>
    %250 = arith.addf %236, %249 : vector<2x256xf32>
    %c6_58 = arith.constant 6 : index
    %c0_59 = arith.constant 0 : index
    %c0_60 = arith.constant 0 : index
    %251 = vector.load %arg1[%c6_58, %c0_59, %c0_60] : memref<8x2x256xf32, #tpu.memory_space<vmem>>, vector<1x2x256xf32>
    %252 = vector.shape_cast %251 : vector<1x2x256xf32> to vector<2x256xf32>
    %c14 = arith.constant 14 : index
    %253 = memref.load %arg4[%c14] : memref<96xf32, #tpu.memory_space<smem>>
    %c46 = arith.constant 46 : index
    %254 = memref.load %arg4[%c46] : memref<96xf32, #tpu.memory_space<smem>>
    %c78 = arith.constant 78 : index
    %255 = memref.load %arg4[%c78] : memref<96xf32, #tpu.memory_space<smem>>
    %256 = vector.broadcast %253 : f32 to vector<2x256xf32>
    %257 = arith.mulf %256, %252 : vector<2x256xf32>
    %258 = arith.addf %244, %257 : vector<2x256xf32>
    %259 = vector.broadcast %254 : f32 to vector<2x256xf32>
    %260 = arith.mulf %259, %252 : vector<2x256xf32>
    %261 = arith.addf %247, %260 : vector<2x256xf32>
    %262 = vector.broadcast %255 : f32 to vector<2x256xf32>
    %263 = arith.mulf %262, %252 : vector<2x256xf32>
    %264 = arith.addf %250, %263 : vector<2x256xf32>
    %c7_61 = arith.constant 7 : index
    %c0_62 = arith.constant 0 : index
    %c0_63 = arith.constant 0 : index
    %265 = vector.load %arg1[%c7_61, %c0_62, %c0_63] : memref<8x2x256xf32, #tpu.memory_space<vmem>>, vector<1x2x256xf32>
    %266 = vector.shape_cast %265 : vector<1x2x256xf32> to vector<2x256xf32>
    %c15 = arith.constant 15 : index
    %267 = memref.load %arg4[%c15] : memref<96xf32, #tpu.memory_space<smem>>
    %c47 = arith.constant 47 : index
    %268 = memref.load %arg4[%c47] : memref<96xf32, #tpu.memory_space<smem>>
    %c79 = arith.constant 79 : index
    %269 = memref.load %arg4[%c79] : memref<96xf32, #tpu.memory_space<smem>>
    %270 = vector.broadcast %267 : f32 to vector<2x256xf32>
    %271 = arith.mulf %270, %266 : vector<2x256xf32>
    %272 = arith.addf %258, %271 : vector<2x256xf32>
    %273 = vector.broadcast %268 : f32 to vector<2x256xf32>
    %274 = arith.mulf %273, %266 : vector<2x256xf32>
    %275 = arith.addf %261, %274 : vector<2x256xf32>
    %276 = vector.broadcast %269 : f32 to vector<2x256xf32>
    %277 = arith.mulf %276, %266 : vector<2x256xf32>
    %278 = arith.addf %264, %277 : vector<2x256xf32>
    %279 = vector.extract_strided_slice %272 {offsets = [0, 255], sizes = [2, 1], strides = [1, 1]} : vector<2x256xf32> to vector<2x1xf32>
    %280 = vector.extract_strided_slice %272 {offsets = [0, 0], sizes = [2, 255], strides = [1, 1]} : vector<2x256xf32> to vector<2x255xf32>
    %281 = tpu.concatenate %279, %280 in 1 : vector<2x1xf32>, vector<2x255xf32> -> vector<2x256xf32>
    %cst_64 = arith.constant 0.000000e+00 : f32
    %282 = vector.shape_cast %2 : vector<1x256xi1> to vector<1x256xi1>
    %283 = vector.broadcast %282 : vector<1x256xi1> to vector<2x256xi1>
    %284 = vector.broadcast %cst_64 : f32 to vector<2x256xf32>
    %285 = arith.select %283, %281, %284 : vector<2x256xi1>, vector<2x256xf32>
    %286 = arith.addf %285, %275 : vector<2x256xf32>
    %287 = vector.extract_strided_slice %278 {offsets = [0, 1], sizes = [2, 255], strides = [1, 1]} : vector<2x256xf32> to vector<2x255xf32>
    %288 = vector.extract_strided_slice %278 {offsets = [0, 0], sizes = [2, 1], strides = [1, 1]} : vector<2x256xf32> to vector<2x1xf32>
    %289 = tpu.concatenate %287, %288 in 1 : vector<2x255xf32>, vector<2x1xf32> -> vector<2x256xf32>
    %cst_65 = arith.constant 0.000000e+00 : f32
    %290 = vector.shape_cast %4 : vector<1x256xi1> to vector<1x256xi1>
    %291 = vector.broadcast %290 : vector<1x256xi1> to vector<2x256xi1>
    %292 = vector.broadcast %cst_65 : f32 to vector<2x256xf32>
    %293 = arith.select %291, %289, %292 : vector<2x256xi1>, vector<2x256xf32>
    %294 = arith.addf %286, %293 : vector<2x256xf32>
    %c1_66 = arith.constant 1 : index
    %295 = memref.load %arg5[%c1_66] : memref<4xf32, #tpu.memory_space<smem>>
    %296 = vector.broadcast %295 : f32 to vector<2x256xf32>
    %297 = arith.addf %294, %296 : vector<2x256xf32>
    %cst_67 = arith.constant dense<0.000000e+00> : vector<2xf32>
    %298 = vector.multi_reduction <add>, %297, %cst_67 [1] : vector<2x256xf32> to vector<2xf32>
    %299 = vector.shape_cast %298 : vector<2xf32> to vector<2x1xf32>
    %cst_68 = arith.constant 2.560000e+02 : f32
    %300 = vector.broadcast %cst_68 : f32 to vector<2x1xf32>
    %301 = arith.divf %299, %300 : vector<2x1xf32>
    %302 = vector.broadcast %301 : vector<2x1xf32> to vector<2x256xf32>
    %303 = arith.subf %297, %302 : vector<2x256xf32>
    %304 = arith.mulf %303, %303 : vector<2x256xf32>
    %cst_69 = arith.constant dense<0.000000e+00> : vector<2xf32>
    %305 = vector.multi_reduction <add>, %304, %cst_69 [1] : vector<2x256xf32> to vector<2xf32>
    %306 = vector.shape_cast %305 : vector<2xf32> to vector<2x1xf32>
    %cst_70 = arith.constant 2.560000e+02 : f32
    %307 = vector.broadcast %cst_70 : f32 to vector<2x1xf32>
    %308 = arith.divf %306, %307 : vector<2x1xf32>
    %cst_71 = arith.constant 9.99999974E-6 : f32
    %309 = vector.broadcast %cst_71 : f32 to vector<2x1xf32>
    %310 = arith.addf %308, %309 : vector<2x1xf32>
    %311 = math.rsqrt %310 : vector<2x1xf32>
    %312 = vector.broadcast %311 : vector<2x1xf32> to vector<2x256xf32>
    %313 = arith.mulf %303, %312 : vector<2x256xf32>
    %c0_72 = arith.constant 0 : index
    %c0_73 = arith.constant 0 : index
    %314 = vector.load %arg2[%c0_72, %c0_73] : memref<1x256xf32, #tpu.memory_space<vmem>>, vector<1x256xf32>
    %315 = vector.broadcast %314 : vector<1x256xf32> to vector<2x256xf32>
    %316 = arith.mulf %313, %315 : vector<2x256xf32>
    %c0_74 = arith.constant 0 : index
    %c0_75 = arith.constant 0 : index
    %317 = vector.load %arg3[%c0_74, %c0_75] : memref<1x256xf32, #tpu.memory_space<vmem>>, vector<1x256xf32>
    %318 = vector.broadcast %317 : vector<1x256xf32> to vector<2x256xf32>
    %319 = arith.addf %316, %318 : vector<2x256xf32>
    %cst_76 = arith.constant 0.000000e+00 : f32
    %320 = vector.broadcast %cst_76 : f32 to vector<2x256xf32>
    %321 = arith.cmpf ogt, %319, %320 : vector<2x256xf32>
    %322 = vector.broadcast %5 : f32 to vector<2x256xf32>
    %323 = arith.mulf %322, %319 : vector<2x256xf32>
    %324 = arith.select %321, %319, %323 : vector<2x256xi1>, vector<2x256xf32>
    %c1_77 = arith.constant 1 : index
    %325 = memref.load %arg6[%c1_77] : memref<12xf32, #tpu.memory_space<smem>>
    %c5_78 = arith.constant 5 : index
    %326 = memref.load %arg6[%c5_78] : memref<12xf32, #tpu.memory_space<smem>>
    %c9_79 = arith.constant 9 : index
    %327 = memref.load %arg6[%c9_79] : memref<12xf32, #tpu.memory_space<smem>>
    %328 = vector.broadcast %325 : f32 to vector<2x256xf32>
    %329 = arith.mulf %328, %324 : vector<2x256xf32>
    %330 = arith.addf %165, %329 : vector<2x256xf32>
    %331 = vector.broadcast %326 : f32 to vector<2x256xf32>
    %332 = arith.mulf %331, %324 : vector<2x256xf32>
    %333 = arith.addf %167, %332 : vector<2x256xf32>
    %334 = vector.broadcast %327 : f32 to vector<2x256xf32>
    %335 = arith.mulf %334, %324 : vector<2x256xf32>
    %336 = arith.addf %169, %335 : vector<2x256xf32>
    %c0_80 = arith.constant 0 : index
    %c0_81 = arith.constant 0 : index
    %c0_82 = arith.constant 0 : index
    %337 = vector.load %arg1[%c0_80, %c0_81, %c0_82] : memref<8x2x256xf32, #tpu.memory_space<vmem>>, vector<1x2x256xf32>
    %338 = vector.shape_cast %337 : vector<1x2x256xf32> to vector<2x256xf32>
    %c16 = arith.constant 16 : index
    %339 = memref.load %arg4[%c16] : memref<96xf32, #tpu.memory_space<smem>>
    %c48 = arith.constant 48 : index
    %340 = memref.load %arg4[%c48] : memref<96xf32, #tpu.memory_space<smem>>
    %c80 = arith.constant 80 : index
    %341 = memref.load %arg4[%c80] : memref<96xf32, #tpu.memory_space<smem>>
    %342 = vector.broadcast %339 : f32 to vector<2x256xf32>
    %343 = arith.mulf %342, %338 : vector<2x256xf32>
    %344 = vector.broadcast %340 : f32 to vector<2x256xf32>
    %345 = arith.mulf %344, %338 : vector<2x256xf32>
    %346 = vector.broadcast %341 : f32 to vector<2x256xf32>
    %347 = arith.mulf %346, %338 : vector<2x256xf32>
    %c1_83 = arith.constant 1 : index
    %c0_84 = arith.constant 0 : index
    %c0_85 = arith.constant 0 : index
    %348 = vector.load %arg1[%c1_83, %c0_84, %c0_85] : memref<8x2x256xf32, #tpu.memory_space<vmem>>, vector<1x2x256xf32>
    %349 = vector.shape_cast %348 : vector<1x2x256xf32> to vector<2x256xf32>
    %c17 = arith.constant 17 : index
    %350 = memref.load %arg4[%c17] : memref<96xf32, #tpu.memory_space<smem>>
    %c49 = arith.constant 49 : index
    %351 = memref.load %arg4[%c49] : memref<96xf32, #tpu.memory_space<smem>>
    %c81 = arith.constant 81 : index
    %352 = memref.load %arg4[%c81] : memref<96xf32, #tpu.memory_space<smem>>
    %353 = vector.broadcast %350 : f32 to vector<2x256xf32>
    %354 = arith.mulf %353, %349 : vector<2x256xf32>
    %355 = arith.addf %343, %354 : vector<2x256xf32>
    %356 = vector.broadcast %351 : f32 to vector<2x256xf32>
    %357 = arith.mulf %356, %349 : vector<2x256xf32>
    %358 = arith.addf %345, %357 : vector<2x256xf32>
    %359 = vector.broadcast %352 : f32 to vector<2x256xf32>
    %360 = arith.mulf %359, %349 : vector<2x256xf32>
    %361 = arith.addf %347, %360 : vector<2x256xf32>
    %c2_86 = arith.constant 2 : index
    %c0_87 = arith.constant 0 : index
    %c0_88 = arith.constant 0 : index
    %362 = vector.load %arg1[%c2_86, %c0_87, %c0_88] : memref<8x2x256xf32, #tpu.memory_space<vmem>>, vector<1x2x256xf32>
    %363 = vector.shape_cast %362 : vector<1x2x256xf32> to vector<2x256xf32>
    %c18 = arith.constant 18 : index
    %364 = memref.load %arg4[%c18] : memref<96xf32, #tpu.memory_space<smem>>
    %c50 = arith.constant 50 : index
    %365 = memref.load %arg4[%c50] : memref<96xf32, #tpu.memory_space<smem>>
    %c82 = arith.constant 82 : index
    %366 = memref.load %arg4[%c82] : memref<96xf32, #tpu.memory_space<smem>>
    %367 = vector.broadcast %364 : f32 to vector<2x256xf32>
    %368 = arith.mulf %367, %363 : vector<2x256xf32>
    %369 = arith.addf %355, %368 : vector<2x256xf32>
    %370 = vector.broadcast %365 : f32 to vector<2x256xf32>
    %371 = arith.mulf %370, %363 : vector<2x256xf32>
    %372 = arith.addf %358, %371 : vector<2x256xf32>
    %373 = vector.broadcast %366 : f32 to vector<2x256xf32>
    %374 = arith.mulf %373, %363 : vector<2x256xf32>
    %375 = arith.addf %361, %374 : vector<2x256xf32>
    %c3_89 = arith.constant 3 : index
    %c0_90 = arith.constant 0 : index
    %c0_91 = arith.constant 0 : index
    %376 = vector.load %arg1[%c3_89, %c0_90, %c0_91] : memref<8x2x256xf32, #tpu.memory_space<vmem>>, vector<1x2x256xf32>
    %377 = vector.shape_cast %376 : vector<1x2x256xf32> to vector<2x256xf32>
    %c19 = arith.constant 19 : index
    %378 = memref.load %arg4[%c19] : memref<96xf32, #tpu.memory_space<smem>>
    %c51 = arith.constant 51 : index
    %379 = memref.load %arg4[%c51] : memref<96xf32, #tpu.memory_space<smem>>
    %c83 = arith.constant 83 : index
    %380 = memref.load %arg4[%c83] : memref<96xf32, #tpu.memory_space<smem>>
    %381 = vector.broadcast %378 : f32 to vector<2x256xf32>
    %382 = arith.mulf %381, %377 : vector<2x256xf32>
    %383 = arith.addf %369, %382 : vector<2x256xf32>
    %384 = vector.broadcast %379 : f32 to vector<2x256xf32>
    %385 = arith.mulf %384, %377 : vector<2x256xf32>
    %386 = arith.addf %372, %385 : vector<2x256xf32>
    %387 = vector.broadcast %380 : f32 to vector<2x256xf32>
    %388 = arith.mulf %387, %377 : vector<2x256xf32>
    %389 = arith.addf %375, %388 : vector<2x256xf32>
    %c4_92 = arith.constant 4 : index
    %c0_93 = arith.constant 0 : index
    %c0_94 = arith.constant 0 : index
    %390 = vector.load %arg1[%c4_92, %c0_93, %c0_94] : memref<8x2x256xf32, #tpu.memory_space<vmem>>, vector<1x2x256xf32>
    %391 = vector.shape_cast %390 : vector<1x2x256xf32> to vector<2x256xf32>
    %c20 = arith.constant 20 : index
    %392 = memref.load %arg4[%c20] : memref<96xf32, #tpu.memory_space<smem>>
    %c52 = arith.constant 52 : index
    %393 = memref.load %arg4[%c52] : memref<96xf32, #tpu.memory_space<smem>>
    %c84 = arith.constant 84 : index
    %394 = memref.load %arg4[%c84] : memref<96xf32, #tpu.memory_space<smem>>
    %395 = vector.broadcast %392 : f32 to vector<2x256xf32>
    %396 = arith.mulf %395, %391 : vector<2x256xf32>
    %397 = arith.addf %383, %396 : vector<2x256xf32>
    %398 = vector.broadcast %393 : f32 to vector<2x256xf32>
    %399 = arith.mulf %398, %391 : vector<2x256xf32>
    %400 = arith.addf %386, %399 : vector<2x256xf32>
    %401 = vector.broadcast %394 : f32 to vector<2x256xf32>
    %402 = arith.mulf %401, %391 : vector<2x256xf32>
    %403 = arith.addf %389, %402 : vector<2x256xf32>
    %c5_95 = arith.constant 5 : index
    %c0_96 = arith.constant 0 : index
    %c0_97 = arith.constant 0 : index
    %404 = vector.load %arg1[%c5_95, %c0_96, %c0_97] : memref<8x2x256xf32, #tpu.memory_space<vmem>>, vector<1x2x256xf32>
    %405 = vector.shape_cast %404 : vector<1x2x256xf32> to vector<2x256xf32>
    %c21 = arith.constant 21 : index
    %406 = memref.load %arg4[%c21] : memref<96xf32, #tpu.memory_space<smem>>
    %c53 = arith.constant 53 : index
    %407 = memref.load %arg4[%c53] : memref<96xf32, #tpu.memory_space<smem>>
    %c85 = arith.constant 85 : index
    %408 = memref.load %arg4[%c85] : memref<96xf32, #tpu.memory_space<smem>>
    %409 = vector.broadcast %406 : f32 to vector<2x256xf32>
    %410 = arith.mulf %409, %405 : vector<2x256xf32>
    %411 = arith.addf %397, %410 : vector<2x256xf32>
    %412 = vector.broadcast %407 : f32 to vector<2x256xf32>
    %413 = arith.mulf %412, %405 : vector<2x256xf32>
    %414 = arith.addf %400, %413 : vector<2x256xf32>
    %415 = vector.broadcast %408 : f32 to vector<2x256xf32>
    %416 = arith.mulf %415, %405 : vector<2x256xf32>
    %417 = arith.addf %403, %416 : vector<2x256xf32>
    %c6_98 = arith.constant 6 : index
    %c0_99 = arith.constant 0 : index
    %c0_100 = arith.constant 0 : index
    %418 = vector.load %arg1[%c6_98, %c0_99, %c0_100] : memref<8x2x256xf32, #tpu.memory_space<vmem>>, vector<1x2x256xf32>
    %419 = vector.shape_cast %418 : vector<1x2x256xf32> to vector<2x256xf32>
    %c22 = arith.constant 22 : index
    %420 = memref.load %arg4[%c22] : memref<96xf32, #tpu.memory_space<smem>>
    %c54 = arith.constant 54 : index
    %421 = memref.load %arg4[%c54] : memref<96xf32, #tpu.memory_space<smem>>
    %c86 = arith.constant 86 : index
    %422 = memref.load %arg4[%c86] : memref<96xf32, #tpu.memory_space<smem>>
    %423 = vector.broadcast %420 : f32 to vector<2x256xf32>
    %424 = arith.mulf %423, %419 : vector<2x256xf32>
    %425 = arith.addf %411, %424 : vector<2x256xf32>
    %426 = vector.broadcast %421 : f32 to vector<2x256xf32>
    %427 = arith.mulf %426, %419 : vector<2x256xf32>
    %428 = arith.addf %414, %427 : vector<2x256xf32>
    %429 = vector.broadcast %422 : f32 to vector<2x256xf32>
    %430 = arith.mulf %429, %419 : vector<2x256xf32>
    %431 = arith.addf %417, %430 : vector<2x256xf32>
    %c7_101 = arith.constant 7 : index
    %c0_102 = arith.constant 0 : index
    %c0_103 = arith.constant 0 : index
    %432 = vector.load %arg1[%c7_101, %c0_102, %c0_103] : memref<8x2x256xf32, #tpu.memory_space<vmem>>, vector<1x2x256xf32>
    %433 = vector.shape_cast %432 : vector<1x2x256xf32> to vector<2x256xf32>
    %c23 = arith.constant 23 : index
    %434 = memref.load %arg4[%c23] : memref<96xf32, #tpu.memory_space<smem>>
    %c55 = arith.constant 55 : index
    %435 = memref.load %arg4[%c55] : memref<96xf32, #tpu.memory_space<smem>>
    %c87 = arith.constant 87 : index
    %436 = memref.load %arg4[%c87] : memref<96xf32, #tpu.memory_space<smem>>
    %437 = vector.broadcast %434 : f32 to vector<2x256xf32>
    %438 = arith.mulf %437, %433 : vector<2x256xf32>
    %439 = arith.addf %425, %438 : vector<2x256xf32>
    %440 = vector.broadcast %435 : f32 to vector<2x256xf32>
    %441 = arith.mulf %440, %433 : vector<2x256xf32>
    %442 = arith.addf %428, %441 : vector<2x256xf32>
    %443 = vector.broadcast %436 : f32 to vector<2x256xf32>
    %444 = arith.mulf %443, %433 : vector<2x256xf32>
    %445 = arith.addf %431, %444 : vector<2x256xf32>
    %446 = vector.extract_strided_slice %439 {offsets = [0, 255], sizes = [2, 1], strides = [1, 1]} : vector<2x256xf32> to vector<2x1xf32>
    %447 = vector.extract_strided_slice %439 {offsets = [0, 0], sizes = [2, 255], strides = [1, 1]} : vector<2x256xf32> to vector<2x255xf32>
    %448 = tpu.concatenate %446, %447 in 1 : vector<2x1xf32>, vector<2x255xf32> -> vector<2x256xf32>
    %cst_104 = arith.constant 0.000000e+00 : f32
    %449 = vector.shape_cast %2 : vector<1x256xi1> to vector<1x256xi1>
    %450 = vector.broadcast %449 : vector<1x256xi1> to vector<2x256xi1>
    %451 = vector.broadcast %cst_104 : f32 to vector<2x256xf32>
    %452 = arith.select %450, %448, %451 : vector<2x256xi1>, vector<2x256xf32>
    %453 = arith.addf %452, %442 : vector<2x256xf32>
    %454 = vector.extract_strided_slice %445 {offsets = [0, 1], sizes = [2, 255], strides = [1, 1]} : vector<2x256xf32> to vector<2x255xf32>
    %455 = vector.extract_strided_slice %445 {offsets = [0, 0], sizes = [2, 1], strides = [1, 1]} : vector<2x256xf32> to vector<2x1xf32>
    %456 = tpu.concatenate %454, %455 in 1 : vector<2x255xf32>, vector<2x1xf32> -> vector<2x256xf32>
    %cst_105 = arith.constant 0.000000e+00 : f32
    %457 = vector.shape_cast %4 : vector<1x256xi1> to vector<1x256xi1>
    %458 = vector.broadcast %457 : vector<1x256xi1> to vector<2x256xi1>
    %459 = vector.broadcast %cst_105 : f32 to vector<2x256xf32>
    %460 = arith.select %458, %456, %459 : vector<2x256xi1>, vector<2x256xf32>
    %461 = arith.addf %453, %460 : vector<2x256xf32>
    %c2_106 = arith.constant 2 : index
    %462 = memref.load %arg5[%c2_106] : memref<4xf32, #tpu.memory_space<smem>>
    %463 = vector.broadcast %462 : f32 to vector<2x256xf32>
    %464 = arith.addf %461, %463 : vector<2x256xf32>
    %cst_107 = arith.constant dense<0.000000e+00> : vector<2xf32>
    %465 = vector.multi_reduction <add>, %464, %cst_107 [1] : vector<2x256xf32> to vector<2xf32>
    %466 = vector.shape_cast %465 : vector<2xf32> to vector<2x1xf32>
    %cst_108 = arith.constant 2.560000e+02 : f32
    %467 = vector.broadcast %cst_108 : f32 to vector<2x1xf32>
    %468 = arith.divf %466, %467 : vector<2x1xf32>
    %469 = vector.broadcast %468 : vector<2x1xf32> to vector<2x256xf32>
    %470 = arith.subf %464, %469 : vector<2x256xf32>
    %471 = arith.mulf %470, %470 : vector<2x256xf32>
    %cst_109 = arith.constant dense<0.000000e+00> : vector<2xf32>
    %472 = vector.multi_reduction <add>, %471, %cst_109 [1] : vector<2x256xf32> to vector<2xf32>
    %473 = vector.shape_cast %472 : vector<2xf32> to vector<2x1xf32>
    %cst_110 = arith.constant 2.560000e+02 : f32
    %474 = vector.broadcast %cst_110 : f32 to vector<2x1xf32>
    %475 = arith.divf %473, %474 : vector<2x1xf32>
    %cst_111 = arith.constant 9.99999974E-6 : f32
    %476 = vector.broadcast %cst_111 : f32 to vector<2x1xf32>
    %477 = arith.addf %475, %476 : vector<2x1xf32>
    %478 = math.rsqrt %477 : vector<2x1xf32>
    %479 = vector.broadcast %478 : vector<2x1xf32> to vector<2x256xf32>
    %480 = arith.mulf %470, %479 : vector<2x256xf32>
    %c0_112 = arith.constant 0 : index
    %c0_113 = arith.constant 0 : index
    %481 = vector.load %arg2[%c0_112, %c0_113] : memref<1x256xf32, #tpu.memory_space<vmem>>, vector<1x256xf32>
    %482 = vector.broadcast %481 : vector<1x256xf32> to vector<2x256xf32>
    %483 = arith.mulf %480, %482 : vector<2x256xf32>
    %c0_114 = arith.constant 0 : index
    %c0_115 = arith.constant 0 : index
    %484 = vector.load %arg3[%c0_114, %c0_115] : memref<1x256xf32, #tpu.memory_space<vmem>>, vector<1x256xf32>
    %485 = vector.broadcast %484 : vector<1x256xf32> to vector<2x256xf32>
    %486 = arith.addf %483, %485 : vector<2x256xf32>
    %cst_116 = arith.constant 0.000000e+00 : f32
    %487 = vector.broadcast %cst_116 : f32 to vector<2x256xf32>
    %488 = arith.cmpf ogt, %486, %487 : vector<2x256xf32>
    %489 = vector.broadcast %5 : f32 to vector<2x256xf32>
    %490 = arith.mulf %489, %486 : vector<2x256xf32>
    %491 = arith.select %488, %486, %490 : vector<2x256xi1>, vector<2x256xf32>
    %c2_117 = arith.constant 2 : index
    %492 = memref.load %arg6[%c2_117] : memref<12xf32, #tpu.memory_space<smem>>
    %c6_118 = arith.constant 6 : index
    %493 = memref.load %arg6[%c6_118] : memref<12xf32, #tpu.memory_space<smem>>
    %c10_119 = arith.constant 10 : index
    %494 = memref.load %arg6[%c10_119] : memref<12xf32, #tpu.memory_space<smem>>
    %495 = vector.broadcast %492 : f32 to vector<2x256xf32>
    %496 = arith.mulf %495, %491 : vector<2x256xf32>
    %497 = arith.addf %330, %496 : vector<2x256xf32>
    %498 = vector.broadcast %493 : f32 to vector<2x256xf32>
    %499 = arith.mulf %498, %491 : vector<2x256xf32>
    %500 = arith.addf %333, %499 : vector<2x256xf32>
    %501 = vector.broadcast %494 : f32 to vector<2x256xf32>
    %502 = arith.mulf %501, %491 : vector<2x256xf32>
    %503 = arith.addf %336, %502 : vector<2x256xf32>
    %c0_120 = arith.constant 0 : index
    %c0_121 = arith.constant 0 : index
    %c0_122 = arith.constant 0 : index
    %504 = vector.load %arg1[%c0_120, %c0_121, %c0_122] : memref<8x2x256xf32, #tpu.memory_space<vmem>>, vector<1x2x256xf32>
    %505 = vector.shape_cast %504 : vector<1x2x256xf32> to vector<2x256xf32>
    %c24 = arith.constant 24 : index
    %506 = memref.load %arg4[%c24] : memref<96xf32, #tpu.memory_space<smem>>
    %c56 = arith.constant 56 : index
    %507 = memref.load %arg4[%c56] : memref<96xf32, #tpu.memory_space<smem>>
    %c88 = arith.constant 88 : index
    %508 = memref.load %arg4[%c88] : memref<96xf32, #tpu.memory_space<smem>>
    %509 = vector.broadcast %506 : f32 to vector<2x256xf32>
    %510 = arith.mulf %509, %505 : vector<2x256xf32>
    %511 = vector.broadcast %507 : f32 to vector<2x256xf32>
    %512 = arith.mulf %511, %505 : vector<2x256xf32>
    %513 = vector.broadcast %508 : f32 to vector<2x256xf32>
    %514 = arith.mulf %513, %505 : vector<2x256xf32>
    %c1_123 = arith.constant 1 : index
    %c0_124 = arith.constant 0 : index
    %c0_125 = arith.constant 0 : index
    %515 = vector.load %arg1[%c1_123, %c0_124, %c0_125] : memref<8x2x256xf32, #tpu.memory_space<vmem>>, vector<1x2x256xf32>
    %516 = vector.shape_cast %515 : vector<1x2x256xf32> to vector<2x256xf32>
    %c25 = arith.constant 25 : index
    %517 = memref.load %arg4[%c25] : memref<96xf32, #tpu.memory_space<smem>>
    %c57 = arith.constant 57 : index
    %518 = memref.load %arg4[%c57] : memref<96xf32, #tpu.memory_space<smem>>
    %c89 = arith.constant 89 : index
    %519 = memref.load %arg4[%c89] : memref<96xf32, #tpu.memory_space<smem>>
    %520 = vector.broadcast %517 : f32 to vector<2x256xf32>
    %521 = arith.mulf %520, %516 : vector<2x256xf32>
    %522 = arith.addf %510, %521 : vector<2x256xf32>
    %523 = vector.broadcast %518 : f32 to vector<2x256xf32>
    %524 = arith.mulf %523, %516 : vector<2x256xf32>
    %525 = arith.addf %512, %524 : vector<2x256xf32>
    %526 = vector.broadcast %519 : f32 to vector<2x256xf32>
    %527 = arith.mulf %526, %516 : vector<2x256xf32>
    %528 = arith.addf %514, %527 : vector<2x256xf32>
    %c2_126 = arith.constant 2 : index
    %c0_127 = arith.constant 0 : index
    %c0_128 = arith.constant 0 : index
    %529 = vector.load %arg1[%c2_126, %c0_127, %c0_128] : memref<8x2x256xf32, #tpu.memory_space<vmem>>, vector<1x2x256xf32>
    %530 = vector.shape_cast %529 : vector<1x2x256xf32> to vector<2x256xf32>
    %c26 = arith.constant 26 : index
    %531 = memref.load %arg4[%c26] : memref<96xf32, #tpu.memory_space<smem>>
    %c58 = arith.constant 58 : index
    %532 = memref.load %arg4[%c58] : memref<96xf32, #tpu.memory_space<smem>>
    %c90 = arith.constant 90 : index
    %533 = memref.load %arg4[%c90] : memref<96xf32, #tpu.memory_space<smem>>
    %534 = vector.broadcast %531 : f32 to vector<2x256xf32>
    %535 = arith.mulf %534, %530 : vector<2x256xf32>
    %536 = arith.addf %522, %535 : vector<2x256xf32>
    %537 = vector.broadcast %532 : f32 to vector<2x256xf32>
    %538 = arith.mulf %537, %530 : vector<2x256xf32>
    %539 = arith.addf %525, %538 : vector<2x256xf32>
    %540 = vector.broadcast %533 : f32 to vector<2x256xf32>
    %541 = arith.mulf %540, %530 : vector<2x256xf32>
    %542 = arith.addf %528, %541 : vector<2x256xf32>
    %c3_129 = arith.constant 3 : index
    %c0_130 = arith.constant 0 : index
    %c0_131 = arith.constant 0 : index
    %543 = vector.load %arg1[%c3_129, %c0_130, %c0_131] : memref<8x2x256xf32, #tpu.memory_space<vmem>>, vector<1x2x256xf32>
    %544 = vector.shape_cast %543 : vector<1x2x256xf32> to vector<2x256xf32>
    %c27 = arith.constant 27 : index
    %545 = memref.load %arg4[%c27] : memref<96xf32, #tpu.memory_space<smem>>
    %c59 = arith.constant 59 : index
    %546 = memref.load %arg4[%c59] : memref<96xf32, #tpu.memory_space<smem>>
    %c91 = arith.constant 91 : index
    %547 = memref.load %arg4[%c91] : memref<96xf32, #tpu.memory_space<smem>>
    %548 = vector.broadcast %545 : f32 to vector<2x256xf32>
    %549 = arith.mulf %548, %544 : vector<2x256xf32>
    %550 = arith.addf %536, %549 : vector<2x256xf32>
    %551 = vector.broadcast %546 : f32 to vector<2x256xf32>
    %552 = arith.mulf %551, %544 : vector<2x256xf32>
    %553 = arith.addf %539, %552 : vector<2x256xf32>
    %554 = vector.broadcast %547 : f32 to vector<2x256xf32>
    %555 = arith.mulf %554, %544 : vector<2x256xf32>
    %556 = arith.addf %542, %555 : vector<2x256xf32>
    %c4_132 = arith.constant 4 : index
    %c0_133 = arith.constant 0 : index
    %c0_134 = arith.constant 0 : index
    %557 = vector.load %arg1[%c4_132, %c0_133, %c0_134] : memref<8x2x256xf32, #tpu.memory_space<vmem>>, vector<1x2x256xf32>
    %558 = vector.shape_cast %557 : vector<1x2x256xf32> to vector<2x256xf32>
    %c28 = arith.constant 28 : index
    %559 = memref.load %arg4[%c28] : memref<96xf32, #tpu.memory_space<smem>>
    %c60 = arith.constant 60 : index
    %560 = memref.load %arg4[%c60] : memref<96xf32, #tpu.memory_space<smem>>
    %c92 = arith.constant 92 : index
    %561 = memref.load %arg4[%c92] : memref<96xf32, #tpu.memory_space<smem>>
    %562 = vector.broadcast %559 : f32 to vector<2x256xf32>
    %563 = arith.mulf %562, %558 : vector<2x256xf32>
    %564 = arith.addf %550, %563 : vector<2x256xf32>
    %565 = vector.broadcast %560 : f32 to vector<2x256xf32>
    %566 = arith.mulf %565, %558 : vector<2x256xf32>
    %567 = arith.addf %553, %566 : vector<2x256xf32>
    %568 = vector.broadcast %561 : f32 to vector<2x256xf32>
    %569 = arith.mulf %568, %558 : vector<2x256xf32>
    %570 = arith.addf %556, %569 : vector<2x256xf32>
    %c5_135 = arith.constant 5 : index
    %c0_136 = arith.constant 0 : index
    %c0_137 = arith.constant 0 : index
    %571 = vector.load %arg1[%c5_135, %c0_136, %c0_137] : memref<8x2x256xf32, #tpu.memory_space<vmem>>, vector<1x2x256xf32>
    %572 = vector.shape_cast %571 : vector<1x2x256xf32> to vector<2x256xf32>
    %c29 = arith.constant 29 : index
    %573 = memref.load %arg4[%c29] : memref<96xf32, #tpu.memory_space<smem>>
    %c61 = arith.constant 61 : index
    %574 = memref.load %arg4[%c61] : memref<96xf32, #tpu.memory_space<smem>>
    %c93 = arith.constant 93 : index
    %575 = memref.load %arg4[%c93] : memref<96xf32, #tpu.memory_space<smem>>
    %576 = vector.broadcast %573 : f32 to vector<2x256xf32>
    %577 = arith.mulf %576, %572 : vector<2x256xf32>
    %578 = arith.addf %564, %577 : vector<2x256xf32>
    %579 = vector.broadcast %574 : f32 to vector<2x256xf32>
    %580 = arith.mulf %579, %572 : vector<2x256xf32>
    %581 = arith.addf %567, %580 : vector<2x256xf32>
    %582 = vector.broadcast %575 : f32 to vector<2x256xf32>
    %583 = arith.mulf %582, %572 : vector<2x256xf32>
    %584 = arith.addf %570, %583 : vector<2x256xf32>
    %c6_138 = arith.constant 6 : index
    %c0_139 = arith.constant 0 : index
    %c0_140 = arith.constant 0 : index
    %585 = vector.load %arg1[%c6_138, %c0_139, %c0_140] : memref<8x2x256xf32, #tpu.memory_space<vmem>>, vector<1x2x256xf32>
    %586 = vector.shape_cast %585 : vector<1x2x256xf32> to vector<2x256xf32>
    %c30 = arith.constant 30 : index
    %587 = memref.load %arg4[%c30] : memref<96xf32, #tpu.memory_space<smem>>
    %c62 = arith.constant 62 : index
    %588 = memref.load %arg4[%c62] : memref<96xf32, #tpu.memory_space<smem>>
    %c94 = arith.constant 94 : index
    %589 = memref.load %arg4[%c94] : memref<96xf32, #tpu.memory_space<smem>>
    %590 = vector.broadcast %587 : f32 to vector<2x256xf32>
    %591 = arith.mulf %590, %586 : vector<2x256xf32>
    %592 = arith.addf %578, %591 : vector<2x256xf32>
    %593 = vector.broadcast %588 : f32 to vector<2x256xf32>
    %594 = arith.mulf %593, %586 : vector<2x256xf32>
    %595 = arith.addf %581, %594 : vector<2x256xf32>
    %596 = vector.broadcast %589 : f32 to vector<2x256xf32>
    %597 = arith.mulf %596, %586 : vector<2x256xf32>
    %598 = arith.addf %584, %597 : vector<2x256xf32>
    %c7_141 = arith.constant 7 : index
    %c0_142 = arith.constant 0 : index
    %c0_143 = arith.constant 0 : index
    %599 = vector.load %arg1[%c7_141, %c0_142, %c0_143] : memref<8x2x256xf32, #tpu.memory_space<vmem>>, vector<1x2x256xf32>
    %600 = vector.shape_cast %599 : vector<1x2x256xf32> to vector<2x256xf32>
    %c31 = arith.constant 31 : index
    %601 = memref.load %arg4[%c31] : memref<96xf32, #tpu.memory_space<smem>>
    %c63 = arith.constant 63 : index
    %602 = memref.load %arg4[%c63] : memref<96xf32, #tpu.memory_space<smem>>
    %c95 = arith.constant 95 : index
    %603 = memref.load %arg4[%c95] : memref<96xf32, #tpu.memory_space<smem>>
    %604 = vector.broadcast %601 : f32 to vector<2x256xf32>
    %605 = arith.mulf %604, %600 : vector<2x256xf32>
    %606 = arith.addf %592, %605 : vector<2x256xf32>
    %607 = vector.broadcast %602 : f32 to vector<2x256xf32>
    %608 = arith.mulf %607, %600 : vector<2x256xf32>
    %609 = arith.addf %595, %608 : vector<2x256xf32>
    %610 = vector.broadcast %603 : f32 to vector<2x256xf32>
    %611 = arith.mulf %610, %600 : vector<2x256xf32>
    %612 = arith.addf %598, %611 : vector<2x256xf32>
    %613 = vector.extract_strided_slice %606 {offsets = [0, 255], sizes = [2, 1], strides = [1, 1]} : vector<2x256xf32> to vector<2x1xf32>
    %614 = vector.extract_strided_slice %606 {offsets = [0, 0], sizes = [2, 255], strides = [1, 1]} : vector<2x256xf32> to vector<2x255xf32>
    %615 = tpu.concatenate %613, %614 in 1 : vector<2x1xf32>, vector<2x255xf32> -> vector<2x256xf32>
    %cst_144 = arith.constant 0.000000e+00 : f32
    %616 = vector.shape_cast %2 : vector<1x256xi1> to vector<1x256xi1>
    %617 = vector.broadcast %616 : vector<1x256xi1> to vector<2x256xi1>
    %618 = vector.broadcast %cst_144 : f32 to vector<2x256xf32>
    %619 = arith.select %617, %615, %618 : vector<2x256xi1>, vector<2x256xf32>
    %620 = arith.addf %619, %609 : vector<2x256xf32>
    %621 = vector.extract_strided_slice %612 {offsets = [0, 1], sizes = [2, 255], strides = [1, 1]} : vector<2x256xf32> to vector<2x255xf32>
    %622 = vector.extract_strided_slice %612 {offsets = [0, 0], sizes = [2, 1], strides = [1, 1]} : vector<2x256xf32> to vector<2x1xf32>
    %623 = tpu.concatenate %621, %622 in 1 : vector<2x255xf32>, vector<2x1xf32> -> vector<2x256xf32>
    %cst_145 = arith.constant 0.000000e+00 : f32
    %624 = vector.shape_cast %4 : vector<1x256xi1> to vector<1x256xi1>
    %625 = vector.broadcast %624 : vector<1x256xi1> to vector<2x256xi1>
    %626 = vector.broadcast %cst_145 : f32 to vector<2x256xf32>
    %627 = arith.select %625, %623, %626 : vector<2x256xi1>, vector<2x256xf32>
    %628 = arith.addf %620, %627 : vector<2x256xf32>
    %c3_146 = arith.constant 3 : index
    %629 = memref.load %arg5[%c3_146] : memref<4xf32, #tpu.memory_space<smem>>
    %630 = vector.broadcast %629 : f32 to vector<2x256xf32>
    %631 = arith.addf %628, %630 : vector<2x256xf32>
    %cst_147 = arith.constant dense<0.000000e+00> : vector<2xf32>
    %632 = vector.multi_reduction <add>, %631, %cst_147 [1] : vector<2x256xf32> to vector<2xf32>
    %633 = vector.shape_cast %632 : vector<2xf32> to vector<2x1xf32>
    %cst_148 = arith.constant 2.560000e+02 : f32
    %634 = vector.broadcast %cst_148 : f32 to vector<2x1xf32>
    %635 = arith.divf %633, %634 : vector<2x1xf32>
    %636 = vector.broadcast %635 : vector<2x1xf32> to vector<2x256xf32>
    %637 = arith.subf %631, %636 : vector<2x256xf32>
    %638 = arith.mulf %637, %637 : vector<2x256xf32>
    %cst_149 = arith.constant dense<0.000000e+00> : vector<2xf32>
    %639 = vector.multi_reduction <add>, %638, %cst_149 [1] : vector<2x256xf32> to vector<2xf32>
    %640 = vector.shape_cast %639 : vector<2xf32> to vector<2x1xf32>
    %cst_150 = arith.constant 2.560000e+02 : f32
    %641 = vector.broadcast %cst_150 : f32 to vector<2x1xf32>
    %642 = arith.divf %640, %641 : vector<2x1xf32>
    %cst_151 = arith.constant 9.99999974E-6 : f32
    %643 = vector.broadcast %cst_151 : f32 to vector<2x1xf32>
    %644 = arith.addf %642, %643 : vector<2x1xf32>
    %645 = math.rsqrt %644 : vector<2x1xf32>
    %646 = vector.broadcast %645 : vector<2x1xf32> to vector<2x256xf32>
    %647 = arith.mulf %637, %646 : vector<2x256xf32>
    %c0_152 = arith.constant 0 : index
    %c0_153 = arith.constant 0 : index
    %648 = vector.load %arg2[%c0_152, %c0_153] : memref<1x256xf32, #tpu.memory_space<vmem>>, vector<1x256xf32>
    %649 = vector.broadcast %648 : vector<1x256xf32> to vector<2x256xf32>
    %650 = arith.mulf %647, %649 : vector<2x256xf32>
    %c0_154 = arith.constant 0 : index
    %c0_155 = arith.constant 0 : index
    %651 = vector.load %arg3[%c0_154, %c0_155] : memref<1x256xf32, #tpu.memory_space<vmem>>, vector<1x256xf32>
    %652 = vector.broadcast %651 : vector<1x256xf32> to vector<2x256xf32>
    %653 = arith.addf %650, %652 : vector<2x256xf32>
    %cst_156 = arith.constant 0.000000e+00 : f32
    %654 = vector.broadcast %cst_156 : f32 to vector<2x256xf32>
    %655 = arith.cmpf ogt, %653, %654 : vector<2x256xf32>
    %656 = vector.broadcast %5 : f32 to vector<2x256xf32>
    %657 = arith.mulf %656, %653 : vector<2x256xf32>
    %658 = arith.select %655, %653, %657 : vector<2x256xi1>, vector<2x256xf32>
    %c3_157 = arith.constant 3 : index
    %659 = memref.load %arg6[%c3_157] : memref<12xf32, #tpu.memory_space<smem>>
    %c7_158 = arith.constant 7 : index
    %660 = memref.load %arg6[%c7_158] : memref<12xf32, #tpu.memory_space<smem>>
    %c11_159 = arith.constant 11 : index
    %661 = memref.load %arg6[%c11_159] : memref<12xf32, #tpu.memory_space<smem>>
    %662 = vector.broadcast %659 : f32 to vector<2x256xf32>
    %663 = arith.mulf %662, %658 : vector<2x256xf32>
    %664 = arith.addf %497, %663 : vector<2x256xf32>
    %665 = vector.broadcast %660 : f32 to vector<2x256xf32>
    %666 = arith.mulf %665, %658 : vector<2x256xf32>
    %667 = arith.addf %500, %666 : vector<2x256xf32>
    %668 = vector.broadcast %661 : f32 to vector<2x256xf32>
    %669 = arith.mulf %668, %658 : vector<2x256xf32>
    %670 = arith.addf %503, %669 : vector<2x256xf32>
    %671 = vector.extract_strided_slice %664 {offsets = [0, 255], sizes = [2, 1], strides = [1, 1]} : vector<2x256xf32> to vector<2x1xf32>
    %672 = vector.extract_strided_slice %664 {offsets = [0, 0], sizes = [2, 255], strides = [1, 1]} : vector<2x256xf32> to vector<2x255xf32>
    %673 = tpu.concatenate %671, %672 in 1 : vector<2x1xf32>, vector<2x255xf32> -> vector<2x256xf32>
    %cst_160 = arith.constant 0.000000e+00 : f32
    %674 = vector.shape_cast %2 : vector<1x256xi1> to vector<1x256xi1>
    %675 = vector.broadcast %674 : vector<1x256xi1> to vector<2x256xi1>
    %676 = vector.broadcast %cst_160 : f32 to vector<2x256xf32>
    %677 = arith.select %675, %673, %676 : vector<2x256xi1>, vector<2x256xf32>
    %678 = arith.addf %677, %667 : vector<2x256xf32>
    %679 = vector.extract_strided_slice %670 {offsets = [0, 1], sizes = [2, 255], strides = [1, 1]} : vector<2x256xf32> to vector<2x255xf32>
    %680 = vector.extract_strided_slice %670 {offsets = [0, 0], sizes = [2, 1], strides = [1, 1]} : vector<2x256xf32> to vector<2x1xf32>
    %681 = tpu.concatenate %679, %680 in 1 : vector<2x255xf32>, vector<2x1xf32> -> vector<2x256xf32>
    %cst_161 = arith.constant 0.000000e+00 : f32
    %682 = vector.shape_cast %4 : vector<1x256xi1> to vector<1x256xi1>
    %683 = vector.broadcast %682 : vector<1x256xi1> to vector<2x256xi1>
    %684 = vector.broadcast %cst_161 : f32 to vector<2x256xf32>
    %685 = arith.select %683, %681, %684 : vector<2x256xi1>, vector<2x256xf32>
    %686 = arith.addf %678, %685 : vector<2x256xf32>
    %c0_162 = arith.constant 0 : index
    %687 = memref.load %arg8[%c0_162] : memref<1xf32, #tpu.memory_space<smem>>
    %688 = vector.broadcast %687 : f32 to vector<2x256xf32>
    %689 = arith.addf %686, %688 : vector<2x256xf32>
    %c0_163 = arith.constant 0 : index
    %c0_164 = arith.constant 0 : index
    %690 = vector.load %arg9[%c0_163, %c0_164] : memref<2x256xf32, #tpu.memory_space<vmem>>, vector<2x256xf32>
    tpu.vector_store %arg9[%c0_163, %c0_164], %689 {strides = array<i32>} : memref<2x256xf32, #tpu.memory_space<vmem>>, vector<2x256xf32>,
    return
  }
  func.func @transform_0(%arg0: i32) -> (i32, i32, i32) {
    %c0_i32 = arith.constant 0 : i32
    %c0_i32_0 = arith.constant 0 : i32
    %c0_i32_1 = arith.constant 0 : i32
    return %c0_i32, %arg0, %c0_i32_0 : i32, i32, i32
  }
  func.func @transform_1(%arg0: i32) -> (i32, i32) {
    %c0_i32 = arith.constant 0 : i32
    %c0_i32_0 = arith.constant 0 : i32
    %c0_i32_1 = arith.constant 0 : i32
    return %c0_i32, %c0_i32_0 : i32, i32
  }
  func.func @transform_2(%arg0: i32) -> (i32, i32) {
    %c0_i32 = arith.constant 0 : i32
    %c0_i32_0 = arith.constant 0 : i32
    %c0_i32_1 = arith.constant 0 : i32
    return %c0_i32, %c0_i32_0 : i32, i32
  }
  func.func @transform_3(%arg0: i32) -> i32 {
    %c0_i32 = arith.constant 0 : i32
    %c0_i32_0 = arith.constant 0 : i32
    return %c0_i32 : i32
  }
  func.func @transform_4(%arg0: i32) -> i32 {
    %c0_i32 = arith.constant 0 : i32
    %c0_i32_0 = arith.constant 0 : i32
    return %c0_i32 : i32
  }
  func.func @transform_5(%arg0: i32) -> i32 {
    %c0_i32 = arith.constant 0 : i32
    %c0_i32_0 = arith.constant 0 : i32
    return %c0_i32 : i32
  }
  func.func @transform_6(%arg0: i32) -> i32 {
    %c0_i32 = arith.constant 0 : i32
    %c0_i32_0 = arith.constant 0 : i32
    return %c0_i32 : i32
  }
  func.func @transform_7(%arg0: i32) -> i32 {
    %c0_i32 = arith.constant 0 : i32
    %c0_i32_0 = arith.constant 0 : i32
    return %c0_i32 : i32
  }
  func.func @transform_8(%arg0: i32) -> (i32, i32) {
    %c0_i32 = arith.constant 0 : i32
    %c0_i32_0 = arith.constant 0 : i32
    return %arg0, %c0_i32 : i32, i32
  }
}

</mosaic_0001>

<bundles_post_ra>
// kernel: squeeze_block.1
= control target key start
LH: loop header
LB: loop body
LE: loop exit
PB: predicated region body
PF: predicated region fallthrough
CT: control target
= control target key end

     0   :  { %15 = vsyncpa [#allocation6], 0  ;;  %s1931_s0 = inlined_call_operand.vmem [shape: f32[8,2,256], index: 0, kind: input, shape index: {}]   ;;  %s1932_s1 = inlined_call_operand.vmem [shape: f32[1,256], index: 1, kind: input, shape index: {}]   ;;  %s1933_s2 = inlined_call_operand.vmem [shape: f32[1,256], index: 2, kind: input, shape index: {}]   ;;  %s1934_s3 = inlined_call_operand.vmem [shape: f32[96], index: 3, kind: input, shape index: {}]   ;;  %s1935_s4 = inlined_call_operand.vmem [shape: f32[4], index: 4, kind: input, shape index: {}]   ;;  %s1936_s5 = inlined_call_operand.vmem [shape: f32[12], index: 5, kind: input, shape index: {}]   ;;  %s1937_s6 = inlined_call_operand.<no memory space> [shape: f32[1], index: 6, kind: input, shape index: {}]   ;;  %s1938_s7 = inlined_call_operand.<no memory space> [shape: f32[1], index: 7, kind: input, shape index: {}]   ;;  %s1939_s8 = inlined_call_operand.hbm [shape: f32[2,256], index: 8, kind: output, shape index: {}]  }
   0x1   :  { %16 = vsyncpa [#allocation8], 0  ;;  %s40_s29 = sshll.u32 %s1935_s4, 4  ;;  %s41_s29 = int_to_ptr.vmem [resolvable:$true] %s40_s29 }
   0x2   :  { %17 = vsyncpa [#allocation5], 0  ;;  %s30_s10 = sshll.u32 %s1934_s3, 4  ;;  %s1116_s11 = scalar_lea.vmem %s41_s29, 16  ;;  %s31_s10 = int_to_ptr.vmem [resolvable:$true] %s30_s10 }
   0x3   :  { %p1117_p0 = scmp.ne.s32.totalorder %s41_s29, %s1116_s11  ;;  %p1121_p1 = scmp.lt.s32.totalorder %s41_s29, %s41_s29 }
   0x4   :  { %p1122_p2 = scmp.lt.s32.totalorder %s1116_s11, %s1116_s11 }
   0x6   :  { %p1123_p3 = por %p1122_p2, %p1121_p1 }
   0x8   :  { %p1124_p4 = pnand %p1123_p3, %p1117_p0 }
   0xa   :  { %1127 = shalt.err (!%p1124_p4)
}
   0xb   :  { %s1180_s12 = smov [#allocation7]   ;;  %s1128_s13 = scalar_lea.vmem %s31_s10, 16 }
   0xc   :  { %43 = dma.vmem_to_smem %s41_s29, 16, %s1180_s12, [#allocation8]  }
   0xd   :  { %p1129_p5 = scmp.ne.s32.totalorder %s31_s10, %s1128_s13  ;;  %p1133_p6 = scmp.lt.s32.totalorder %s31_s10, %s31_s10 }
   0xe   :  { %p1134_p7 = scmp.lt.s32.totalorder %s1128_s13, %s1128_s13 }
  0x10   :  { %p1135_p8 = por %p1134_p7, %p1133_p6 }
  0x12   :  { %p1136_p9 = pnand %p1135_p8, %p1129_p5 }
  0x14   :  { %1139 = shalt.err (!%p1136_p9)
}
  0x15   :  { %s1181_s4 = smov [#allocation4]   ;;  %s50_s15 = sshll.u32 %s1936_s5, 4  ;;  %s51_s15 = int_to_ptr.vmem [resolvable:$true] %s50_s15 }
  0x16   :  { %33 = dma.vmem_to_smem %s31_s10, 16, %s1181_s4, [#allocation6]  }
  0x17   :  { %s1140_s16 = scalar_lea.vmem %s51_s15, 16  ;;  %p1145_p11 = scmp.lt.s32.totalorder %s51_s15, %s51_s15 }
  0x18   :  { %p1141_p10 = scmp.ne.s32.totalorder %s51_s15, %s1140_s16  ;;  %p1146_p12 = scmp.lt.s32.totalorder %s1140_s16, %s1140_s16 }
  0x1a   :  { %p1147_p13 = por %p1146_p12, %p1145_p11 }
  0x1c   :  { %p1148_p0 = pnand %p1147_p13, %p1141_p10 }
  0x1e   :  { %1151 = shalt.err (!%p1148_p0)
}
  0x1f   :  { %s1182_s17 = smov [#allocation9]  }
  0x20   :  { %53 = dma.vmem_to_smem %s51_s15, 16, %s1182_s17, [#allocation8]  }
  0x21   :  { %1174 = dma.done.wait [#allocation6], 16  }
  0x22   :  { %1175 = vsyncadd [#allocation6], 4294967280 }
  0x23   :  { %1176 = dma.done.wait [#allocation8], 32  }
  0x24   :  { %1177 = vsyncadd [#allocation8], 4294967264 }
  0x25   :  { %67 = sfence }
  0x26   :  { %s1016_s18 = sld [smem:[#allocation4 + $0x8]]  ;;  %v68_v0 = vlaneseq  ;;  %v1183_v1 = vmov 1983009808   ;;  %s1019_s5 = sld [smem:[#allocation4 + $0x9]]  ;;  %v1244_v3 = vld [vmem:[%s1931_s0] sm:$0xf] }
  0x27   :  { %v186_v2 = vunpack.c.l.s4 %v1183_v1  ;;  %s1022_s19 = sld [smem:[#allocation4 + $0xa]]  ;;  %s1246_s22 = sld [smem:[#allocation4 + $0xb]]  ;;  %v1253_v4 = vld [vmem:[%s1931_s0 + $0x4] sm:$0xf]  ;;  %v1258_v5 = vld [vmem:[%s1931_s0 + $0x8] sm:$0xf] }
  0x28   :  { %s1248_s23 = sld [smem:[#allocation4 + $0xc]]  ;;  %s1260_s28 = sld [smem:[#allocation4 + $0xd]]  ;;  %v1267_v6 = vld [vmem:[%s1931_s0 + $0xc] sm:$0xf]  ;;  %v1274_v8 = vshrl.u32 %v68_v0, 7  ;;  %vm198_vm0 = vcmask 7168  }
  0x29   :  { %s1262_s29 = sld [smem:[#allocation4 + $0xe]]  ;;  %s1269_s10 = sld [smem:[#allocation4 + $0xf]]  ;;  %v187_v7 = vunpack.c.0.s8 %v186_v2  ;;  %v1283_v9 = vld [vmem:[%s1931_s0 + $0x10] sm:$0xf]  ;;  %v1292_v11 = vld [vmem:[%s1931_s0 + $0x14] sm:$0xf] }
  0x2a   :  { %s1271_s11 = sld [smem:[#allocation4]]  ;;  %s1276_s12 = sld [smem:[#allocation4 + $0x1]]  ;;  %v1310_v19 = vld [vmem:[%s1931_s0 + $0x18] sm:$0xf]  ;;  %v1324_v23 = vld [vmem:[%s1931_s0 + $0x1c] sm:$0xf] }
  0x2b   :  { %s1278_s13 = sld [smem:[#allocation4 + $0x2]]  ;;  %s1285_s14 = sld [smem:[#allocation4 + $0x3]]  ;;  %v1313_v20 = vsub.s32 %v187_v7, %v1274_v8  ;;  %vm235_vm2 = vcmask 1039360   ;;  %vm253_vm4 = vcmask 1041408  }
  0x2c   :  { %v325_v10 = vstv %s1016_s18  ;;  %s1287_s15 = sld [smem:[#allocation4 + $0x4]]  ;;  %v334_v13 = vstv %s1019_s5  ;;  %s1295_s20 = sld [smem:[#allocation4 + $0x5]] }
  0x2d   :  { %v326_v12 = vmul.f32 %v325_v10, %v1244_v3  ;;  %v346_v14 = vstv %s1022_s19  ;;  %s1297_s21 = sld [smem:[#allocation4 + $0x6]]  ;;  %v335_v15 = vmul.f32 %v1253_v4, %v334_v13  ;;  %v358_v17 = vstv %s1246_s22  ;;  %s1303_s18 = sld [smem:[#allocation4 + $0x7]] }
  0x2e   :  { %v347_v16 = vmul.f32 %v1258_v5, %v346_v14  ;;  %v370_v18 = vstv %s1248_s23  ;;  %s1305_s24 = sld [smem:[#allocation4 + $0x10]]  ;;  %v359_v21 = vmul.f32 %v1267_v6, %v358_v17  ;;  %v382_v22 = vstv %s1260_s28  ;;  %s1317_s19 = sld [smem:[#allocation4 + $0x11]] }
  0x2f   :  { %s1319_s22 = sld [smem:[#allocation4 + $0x12]]  ;;  %v336_v24 = vadd.f32 %v335_v15, %v326_v12  ;;  %v371_v25 = vmul.f32 %v1283_v9, %v370_v18  ;;  %v383_v26 = vmul.f32 %v1292_v11, %v382_v22  ;;  %v394_v27 = vstv %s1262_s29  ;;  %s1329_s27 = sld [smem:[#allocation4 + $0x13]] }
  0x30   :  { %s1331_s28 = sld [smem:[#allocation4 + $0x14]]  ;;  %v406_v28 = vstv %s1269_s10  ;;  %v80_v29 = vstv %s1271_s11  ;;  %v91_v30 = vstv %s1276_s12  ;;  %s1337_s30 = sld [smem:[#allocation4 + $0x15]]  ;;  %v395_v36 = vmul.f32 %v1310_v19, %v394_v27 }
  0x31   :  { %v105_v31 = vstv %s1278_s13  ;;  %v348_v32 = vadd.f32 %v347_v16, %v336_v24  ;;  %v81_v33 = vmul.f32 %v80_v29, %v1244_v3  ;;  %v92_v34 = vmul.f32 %v1253_v4, %v91_v30  ;;  %s1342_s0 = sld [smem:[#allocation4 + $0x16]]  ;;  %s1348_s29 = sld [smem:[#allocation4 + $0x40]] }
  0x32   :  { %v106_v35 = vmul.f32 %v1258_v5, %v105_v31  ;;  %v119_v37 = vstv %s1285_s14  ;;  %v133_v38 = vstv %s1287_s15  ;;  %v147_v39 = vstv %s1295_s20  ;;  %s1350_s9 = sld [smem:[#allocation4 + $0x41]]  ;;  %s1354_s10 = sld [smem:[#allocation4 + $0x17]] }
  0x33   :  { %v360_v40 = vadd.f32 %v359_v21, %v348_v32  ;;  %v407_v41 = vmul.f32 %v1324_v23, %v406_v28  ;;  %v93_v42 = vadd.f32 %v92_v34, %v81_v33  ;;  %v120_v43 = vmul.f32 %v1267_v6, %v119_v37  ;;  %s1360_s11 = sld [smem:[#allocation4 + $0x42]]  ;;  %s1362_s12 = sld [smem:[#allocation4 + $0x43]] }
  0x34   :  { %v134_v44 = vmul.f32 %v1283_v9, %v133_v38  ;;  %v148_v45 = vmul.f32 %v1292_v11, %v147_v39  ;;  %v161_v46 = vstv %s1297_s21  ;;  %v525_v47 = vstv %s1305_s24  ;;  %s1370_s13 = sld [smem:[#allocation4 + $0x44]]  ;;  %s1372_s4 = sld [smem:[#allocation4 + $0x45]] }
  0x35   :  { %v372_v48 = vadd.f32 %v371_v25, %v360_v40  ;;  %v107_v49 = vadd.f32 %v106_v35, %v93_v42  ;;  %v175_v50 = vstv %s1303_s18  ;;  %v526_v51 = vmul.f32 %v525_v47, %v1244_v3  ;;  %s1380_s3 = sld [smem:[#allocation4 + $0x46]]  ;;  %s1383_s14 = sld [smem:[#allocation4 + $0x47]] }
  0x36   :  { %v534_v52 = vstv %s1317_s19  ;;  %v546_v53 = vstv %s1319_s22  ;;  %v558_v54 = vstv %s1329_s27  ;;  %v570_v55 = vstv %s1331_s28  ;;  %s1385_s15 = sld [smem:[#allocation4 + $0x18]]  ;;  %s1391_s16 = sld [smem:[#allocation4 + $0x19]] }
  0x37   :  { %v384_v56 = vadd.f32 %v383_v26, %v372_v48  ;;  %v121_v57 = vadd.f32 %v120_v43, %v107_v49  ;;  %v535_v58 = vmul.f32 %v1253_v4, %v534_v52  ;;  %v547_v59 = vmul.f32 %v1258_v5, %v546_v53  ;;  %s1393_s17 = sld [smem:[#allocation4 + $0x1a]]  ;;  %s1400_s20 = sld [smem:[#allocation4 + $0x1b]] }
  0x38   :  { %v162_v60 = vmul.f32 %v1310_v19, %v161_v46  ;;  %v176_v61 = vmul.f32 %v1324_v23, %v175_v50  ;;  %v559_v62 = vmul.f32 %v1267_v6, %v558_v54  ;;  %v582_v63 = vstv %s1337_s30  ;;  %s1402_s21 = sld [smem:[#allocation4 + $0x1c]]  ;;  %s1411_s18 = sld [smem:[#allocation4 + $0x1d]] }
  0x39   :  { %v396_v1 = vadd.f32 %v395_v36, %v384_v56  ;;  %v135_v2 = vadd.f32 %v134_v44, %v121_v57  ;;  %v536_v7 = vadd.f32 %v535_v58, %v526_v51  ;;  %v571_v10 = vmul.f32 %v1283_v9, %v570_v55  ;;  %s1413_s24 = sld [smem:[#allocation4 + $0x1e]]  ;;  %s1184_s25 = smov 1  }
  0x3a   :  { %v583_v12 = vmul.f32 %v1292_v11, %v582_v63  ;;  %v594_v13 = vstv %s1342_s0  ;;  %v84_v14 = vstv %s1348_s29  ;;  %v97_v15 = vstv %s1350_s9  ;;  %s1418_s5 = sld [smem:[#allocation4 + $0x1f]]  ;;  %s1423_s19 = sld [smem:[#allocation4 + $0x48]] }
  0x3b   :  { %v408_v16 = vadd.f32 %v407_v41, %v396_v1  ;;  %v149_v17 = vadd.f32 %v148_v45, %v135_v2  ;;  %v548_v18 = vadd.f32 %v547_v59, %v536_v7  ;;  %v606_v21 = vstv %s1354_s10  ;;  %s1425_s22 = sld [smem:[#allocation4 + $0x49]]  ;;  %s1432_s23 = sld [smem:[#allocation4 + $0x4a]] }
  0x3c   :  { %v85_v22 = vmul.f32 %v84_v14, %v1244_v3  ;;  %v98_v24 = vmul.f32 %v1253_v4, %v97_v15  ;;  %v111_v25 = vstv %s1360_s11  ;;  %v125_v26 = vstv %s1362_s12  ;;  %s1437_s26 = sld [smem:[#allocation4 + $0x4b]]  ;;  %s1439_s27 = sld [smem:[#allocation4 + $0x4c]] }
  0x3d   :  { %v1405_v27 = vrot.slane %v408_v16, %v1313_v20  ;;  %v163_v28 = vadd.f32 %v162_v60, %v149_v17  ;;  %v560_v29 = vadd.f32 %v559_v62, %v548_v18  ;;  %v112_v30 = vmul.f32 %v1258_v5, %v111_v25  ;;  %s1449_s28 = sld [smem:[#allocation4 + $0x4d]]  ;;  %s1451_s30 = sld [smem:[#allocation4 + $0x4e]] }
  0x3e   :  { %v99_v31 = vadd.f32 %v98_v24, %v85_v22  ;;  %v126_v32 = vmul.f32 %v1267_v6, %v125_v26  ;;  %v139_v33 = vstv %s1370_s13  ;;  %v153_v34 = vstv %s1372_s4  ;;  %s1455_s0 = sld [smem:[#allocation4 + $0x4f]]  ;;  %s1457_s29 = sld [smem:[#allocation4 + $0x50]] }
  0x3f   :  { %427 = vrot.lane.b32.xlu1 %v1405_v27, %s1184_s25  ;;  %v177_v35 = vadd.f32 %v176_v61, %v163_v28  ;;  %v572_v36 = vadd.f32 %v571_v10, %v560_v29  ;;  %v595_v37 = vmul.f32 %v1310_v19, %v594_v13  ;;  %v607_v38 = vmul.f32 %v1324_v23, %v606_v21  ;;  %s1462_s9 = sld [smem:[#allocation4 + $0x51]]  ;;  %s1464_s10 = sld [smem:[#allocation4 + $0x52]] }
  0x40   :  { %v113_v39 = vadd.f32 %v112_v30, %v99_v31  ;;  %v140_v40 = vmul.f32 %v1283_v9, %v139_v33  ;;  %v167_v41 = vstv %s1380_s3  ;;  %v154_v44 = vmul.f32 %v1292_v11, %v153_v34  ;;  %s1471_s11 = sld [smem:[#allocation4 + $0x53]]  ;;  %s1476_s12 = sld [smem:[#allocation4 + $0x54]] }
  0x41   :  { %v1428_v42 = vrot.slane %v177_v35, %v1313_v20  ;;  %v584_v43 = vadd.f32 %v583_v12, %v572_v36  ;;  %v181_v45 = vstv %s1383_s14  ;;  %v725_v47 = vstv %s1385_s15  ;;  %s1478_s13 = sld [smem:[#allocation4 + $0x55]]  ;;  %s1490_s4 = sld [smem:[#allocation4 + $0x56]] }
  0x42   :  { %v127_v46 = vadd.f32 %v126_v32, %v113_v39  ;;  %v734_v48 = vstv %s1391_s16  ;;  %v746_v49 = vstv %s1393_s17  ;;  %v168_v51 = vmul.f32 %v1310_v19, %v167_v41  ;;  %s1498_s3 = sld [smem:[#allocation4 + $0x58]]  ;;  %s1502_s14 = sld [smem:[#allocation4 + $0x57]] }
  0x43   :  { %196 = vrot.lane.b32.xlu0 %v1428_v42, %s1184_s25  ;;  %v596_v50 = vadd.f32 %v595_v37, %v584_v43  ;;  %v726_v52 = vmul.f32 %v725_v47, %v1244_v3  ;;  %v735_v53 = vmul.f32 %v1253_v4, %v734_v48  ;;  %v747_v55 = vmul.f32 %v1258_v5, %v746_v49  ;;  %s1504_s15 = sld [smem:[#allocation4 + $0x59]]  ;;  %s1185_s16 = smov 127  }
  0x44   :  { %v141_v54 = vadd.f32 %v140_v40, %v127_v46  ;;  %v758_v56 = vstv %s1400_s20  ;;  %v770_v57 = vstv %s1402_s21  ;;  %v182_v59 = vmul.f32 %v1324_v23, %v181_v45  ;;  %s1512_s17 = sld [smem:[#allocation4 + $0x5a]]  ;;  %s1514_s20 = sld [smem:[#allocation4 + $0x5b]] }
  0x45   :  { %v608_v58 = vadd.f32 %v607_v38, %v596_v50  ;;  %v736_v60 = vadd.f32 %v735_v53, %v726_v52  ;;  %v759_v61 = vmul.f32 %v1267_v6, %v758_v56  ;;  %v771_v63 = vmul.f32 %v1283_v9, %v770_v57  ;;  %s1522_s21 = sld [smem:[#allocation4 + $0x5c]] }
  0x46   :  { %v155_v62 = vadd.f32 %v154_v44, %v141_v54  ;;  %v782_v1 = vstv %s1411_s18  ;;  %v794_v2 = vstv %s1413_s24  ;;  %v806_v13 = vstv %s1418_s5  ;;  %s1527_s18 = sld [smem:[#allocation4 + $0x5d]]  ;;  %s1535_s24 = sld [smem:[#allocation4 + $0x5e]] }
  0x47   :  { %v1467_v7 = vrot.slane %v608_v58, %v1313_v20  ;;  %v748_v10 = vadd.f32 %v747_v55, %v736_v60  ;;  %v783_v12 = vmul.f32 %v1292_v11, %v782_v1  ;;  %v795_v15 = vmul.f32 %v1310_v19, %v794_v2  ;;  %s1544_s5 = sld [smem:[#allocation4 + $0x5f]] }
  0x48   :  { %v169_v14 = vadd.f32 %v168_v51, %v155_v62  ;;  %v329_v16 = vstv %s1423_s19  ;;  %v340_v17 = vstv %s1425_s22  ;;  %v352_v24 = vstv %s1432_s23  ;;  %s1017_s19 = sld [smem:[#allocation4 + $0x28]]  ;;  %s1020_s22 = sld [smem:[#allocation4 + $0x29]] }
  0x49   :  { %627 = vrot.lane.b32.xlu1 %v1467_v7, %s1184_s25  ;;  %v760_v18 = vadd.f32 %v759_v61, %v748_v10  ;;  %v330_v21 = vmul.f32 %v329_v16, %v1244_v3  ;;  %v341_v22 = vmul.f32 %v1253_v4, %v340_v17  ;;  %v353_v26 = vmul.f32 %v1258_v5, %v352_v24  ;;  %s984_s23 = sld [smem:[#allocation4 + $0x20]] }
  0x4a   :  { %v183_v25 = vadd.f32 %v182_v59, %v169_v14  ;;  %v364_v28 = vstv %s1437_s26  ;;  %v376_v29 = vstv %s1439_s27  ;;  %v807_v31 = vmul.f32 %v1324_v23, %v806_v13  ;;  %s988_s26 = sld [smem:[#allocation4 + $0x21]]  ;;  %s1023_s27 = sld [smem:[#allocation4 + $0x2a]] }
  0x4b   :  { %v772_v30 = vadd.f32 %v771_v63, %v760_v18  ;;  %v342_v32 = vadd.f32 %v341_v22, %v330_v21  ;;  %v365_v33 = vmul.f32 %v1267_v6, %v364_v28  ;;  %v377_v35 = vmul.f32 %v1283_v9, %v376_v29 }
  0x4c   :  { %v1493_v34 = vrot.slane %v183_v25, %v1313_v20  ;;  %v388_v36 = vstv %s1449_s28  ;;  %v400_v37 = vstv %s1451_s30  ;;  %v412_v41 = vstv %s1455_s0  ;;  %s992_s28 = sld [smem:[#allocation4 + $0x22]]  ;;  %s1026_s30 = sld [smem:[#allocation4 + $0x2b]] }
  0x4d   :  { %v784_v38 = vadd.f32 %v783_v12, %v772_v30  ;;  %v354_v39 = vadd.f32 %v353_v26, %v342_v32  ;;  %v389_v40 = vmul.f32 %v1292_v11, %v388_v36  ;;  %v401_v43 = vmul.f32 %v1310_v19, %v400_v37  ;;  %s1578_s0 = sld [smem:[#allocation4 + $0x30]] }
  0x4e   :  { %231 = vrot.lane.b32.xlu0 %v1493_v34, %s1185_s16  ;;  %v529_v44 = vstv %s1457_s29  ;;  %v540_v45 = vstv %s1462_s9  ;;  %v552_v46 = vstv %s1464_s10  ;;  %v413_v59 = vmul.f32 %v1324_v23, %v412_v41  ;;  %s1580_s29 = sld [smem:[#allocation4 + $0x31]]  ;;  %s1584_s9 = sld [smem:[#allocation4 + $0x23]] }
  0x4f   :  { %v796_v47 = vadd.f32 %v795_v15, %v784_v38  ;;  %v366_v48 = vadd.f32 %v365_v33, %v354_v39  ;;  %v530_v49 = vmul.f32 %v529_v44, %v1244_v3  ;;  %v541_v50 = vmul.f32 %v1253_v4, %v540_v45  ;;  %s1586_s10 = sld [smem:[#allocation4 + $0x2c]] }
  0x50   :  { %v553_v51 = vmul.f32 %v1258_v5, %v552_v46  ;;  %v564_v52 = vstv %s1471_s11  ;;  %v576_v53 = vstv %s1476_s12  ;;  %v588_v54 = vstv %s1478_s13  ;;  %s1588_s11 = sld [smem:[#allocation4 + $0x32]]  ;;  %s1592_s12 = sld [smem:[#allocation4 + $0x38]] }
  0x51   :  { %v808_v55 = vadd.f32 %v807_v31, %v796_v47  ;;  %v378_v56 = vadd.f32 %v377_v35, %v366_v48  ;;  %v542_v57 = vadd.f32 %v541_v50, %v530_v49  ;;  %v565_v58 = vmul.f32 %v1267_v6, %v564_v52  ;;  %s1594_s13 = sld [smem:[#allocation4 + $0x39]] }
  0x52   :  { %v577_v60 = vmul.f32 %v1283_v9, %v576_v53  ;;  %v600_v1 = vstv %s1490_s4  ;;  %v423_v2 = vcombine.high %v1405_v27, %v1405_v27  ;;  %v589_v10 = vmul.f32 %v1292_v11, %v588_v54  ;;  %s1597_s4 = sld [smem:[#allocation4 + $0x24]] }
  0x53   :  { %v822_v61 = vrot.slane %v808_v55, %v1313_v20  ;;  %v390_v62 = vadd.f32 %v389_v40, %v378_v56  ;;  %v554_v63 = vadd.f32 %v553_v51, %v542_v57  ;;  %v729_v12 = vstv %s1498_s3  ;;  %s1599_s3 = sld [smem:[#allocation4 + $0x2d]] }
  0x54   :  { %v612_v15 = vstv %s1502_s14  ;;  %v730_v16 = vmul.f32 %v729_v12, %v1244_v3  ;;  %v601_v17 = vmul.f32 %v1310_v19, %v600_v1  ;;  %v740_v18 = vstv %s1504_s15  ;;  %s1603_s14 = sld [smem:[#allocation4 + $0x33]]  ;;  %s1606_s15 = sld [smem:[#allocation4 + $0x3a]] }
  0x55   :  { %827 = vrot.lane.b32.xlu1 %v822_v61, %s1184_s25  ;;  %v402_v13 = vadd.f32 %v401_v43, %v390_v62  ;;  %v566_v14 = vadd.f32 %v565_v58, %v554_v63  ;;  %v752_v21 = vstv %s1512_s17  ;;  %v764_v22 = vstv %s1514_s20  ;;  %s1610_s17 = sld [smem:[#allocation4 + $0x25]]  ;;  %s1613_s20 = sld [smem:[#allocation4 + $0x2e]] }
  0x56   :  { %v741_v25 = vmul.f32 %v1253_v4, %v740_v18  ;;  %v753_v26 = vmul.f32 %v1258_v5, %v752_v21  ;;  %v613_v28 = vmul.f32 %v1324_v23, %v612_v15  ;;  %v230_v29 = vcombine.high %v1493_v34, %v1493_v34 }
  0x57   :  { %v414_v27 = vadd.f32 %v413_v59, %v402_v13  ;;  %v578_v24 = vadd.f32 %v577_v60, %v566_v14  ;;  %v776_v30 = vstv %s1522_s21  ;;  %v765_v35 = vmul.f32 %v1267_v6, %v764_v22  ;;  %s1618_s21 = sld [smem:[#allocation4 + $0x34]] }
  0x58   :  { %v742_v33 = vadd.f32 %v741_v25, %v730_v16  ;;  %v788_v36 = vstv %s1527_s18  ;;  %v777_v39 = vmul.f32 %v1283_v9, %v776_v30  ;;  %v800_v40 = vstv %s1535_s24  ;;  %s1623_s18 = sld [smem:[#allocation4 + $0x3b]]  ;;  %s1627_s24 = sld [smem:[#allocation4 + $0x26]] }
  0x59   :  { %v455_v31 = vrot.slane %v414_v27, %v1313_v20  ;;  %424 = vrot.lane.b32.xlu1 %v423_v2, %s1184_s25  ;;  %v590_v32 = vadd.f32 %v589_v10, %v578_v24  ;;  %v789_v44 = vmul.f32 %v1292_v11, %v788_v36  ;;  %v812_v45 = vstv %s1544_s5  ;;  %s1630_s5 = sld [smem:[#allocation4 + $0x2f]] }
  0x5a   :  { %v754_v38 = vadd.f32 %v753_v26, %v742_v33  ;;  %v801_v48 = vmul.f32 %v1310_v19, %v800_v40  ;;  %v192_v49 = vcombine.high %v1428_v42, %v1428_v42  ;;  %v813_v52 = vmul.f32 %v1324_v23, %v812_v45 }
  0x5b   :  { %457 = vrot.lane.b32.xlu0 %v455_v31, %s1185_s16  ;;  %v602_v37 = vadd.f32 %v601_v17, %v590_v32  ;;  %v456_v34 = vcombine.high %v455_v31, %v455_v31  ;;  %v623_v54 = vcombine.high %v1467_v7, %v1467_v7  ;;  %v823_v42 = vcombine.high %v822_v61, %v822_v61 }
  0x5c   :  { %v766_v43 = vadd.f32 %v765_v35, %v754_v38  ;;  %v327_v7 = vstv %s1017_s19  ;;  %v337_v58 = vstv %s1020_s22  ;;  %v82_v61 = vstv %s984_s23  ;;  %s1634_s19 = sld [smem:[#allocation4 + $0x35]]  ;;  %s1642_s22 = sld [smem:[#allocation4 + $0x3c]] }
  0x5d   :  { %v614_v41 = vadd.f32 %v613_v28, %v602_v37  ;;  %233 = vrot.lane.b32.xlu1 %v230_v29, %s1185_s16  ;;  %v328_v59 = vmul.f32 %v327_v7, %v1244_v3  ;;  %v338_v60 = vmul.f32 %v1253_v4, %v337_v58  ;;  %v94_v62 = vstv %s988_s26  ;;  %s1646_s23 = sld [smem:[#allocation4 + $0x27]]  ;;  %s1651_s26 = sld [smem:[#allocation4 + $0x36]] }
  0x5e   :  { %v778_v47 = vadd.f32 %v777_v39, %v766_v43  ;;  %v349_v63 = vstv %s1023_s27  ;;  %v83_v1 = vmul.f32 %v82_v61, %v1244_v3  ;;  %v95_v2 = vmul.f32 %v1253_v4, %v94_v62  ;;  %s1656_s27 = sld [smem:[#allocation4 + $0x3d]] }
  0x5f   :  { %v655_v46 = vrot.slane %v614_v41, %v1313_v20  ;;  %v339_v10 = vadd.f32 %v338_v60, %v328_v59  ;;  %v350_v12 = vmul.f32 %v1258_v5, %v349_v63  ;;  %v108_v13 = vstv %s992_s28  ;;  %s1667_s28 = sld [smem:[#allocation4 + $0x37]] }
  0x60   :  { %v790_v51 = vadd.f32 %v789_v44, %v778_v47  ;;  %v361_v14 = vstv %s1026_s30  ;;  %v527_v15 = vstv %s1578_s0  ;;  %v537_v16 = vstv %s1580_s29  ;;  %s1672_s30 = sld [smem:[#allocation4 + $0x3e]]  ;;  %s1685_s0 = sld [smem:[#allocation4 + $0x3f]] }
  0x61   :  { %657 = vrot.lane.b32.xlu0 %v655_v46, %s1185_s16  ;;  %459 = vrot.lane.b32.xlu1 %v456_v34, %s1185_s16  ;;  %v656_v50 = vcombine.high %v655_v46, %v655_v46  ;;  %v96_v17 = vadd.f32 %v95_v2, %v83_v1  ;;  %v109_v18 = vmul.f32 %v1258_v5, %v108_v13  ;;  %v122_v27 = vstv %s1584_s9  ;;  %s1695_s29 = sld [smem:[#allocation7 + $0x1]]  ;;  %s1712_s9 = sld [smem:[#allocation7]] }
  0x62   :  { %v802_v53 = vadd.f32 %v801_v48, %v790_v51  ;;  %v351_v21 = vadd.f32 %v350_v12, %v339_v10  ;;  %v362_v22 = vmul.f32 %v1267_v6, %v361_v14  ;;  %v373_v24 = vstv %s1586_s10  ;;  %s1723_s10 = sld [smem:[#allocation7 + $0x2]] }
  0x63   :  { %v528_v25 = vmul.f32 %v527_v15, %v1244_v3  ;;  %v538_v26 = vmul.f32 %v1253_v4, %v537_v16  ;;  %v549_v28 = vstv %s1588_s11  ;;  %v110_v29 = vadd.f32 %v109_v18, %v96_v17  ;;  %s1745_s11 = sld [smem:[#allocation7 + $0x3]] }
  0x64   :  { %v814_v55 = vadd.f32 %v813_v52, %v802_v53  ;;  %v123_v30 = vmul.f32 %v1267_v6, %v122_v27  ;;  %v727_v31 = vstv %s1592_s12  ;;  %v737_v32 = vstv %s1594_s13 }
  0x65   :  { %193 = vrot.lane.b32.xlu0 %v192_v49, %s1184_s25  ;;  %659 = vrot.lane.b32.xlu1 %v656_v50, %s1185_s16  ;;  %v363_v33 = vadd.f32 %v362_v22, %v351_v21  ;;  %v374_v35 = vmul.f32 %v1283_v9, %v373_v24  ;;  %v136_v36 = vstv %s1597_s4  ;;  %v385_v37 = vstv %s1599_s3 }
  0x66   :  { %v855_v56 = vrot.slane %v814_v55, %v1313_v20  ;;  %v539_v38 = vadd.f32 %v538_v26, %v528_v25  ;;  %v550_v39 = vmul.f32 %v1258_v5, %v549_v28  ;;  %v561_v40 = vstv %s1603_s14  ;;  %s1813_s14 = sld [smem:[#allocation9]] }
  0x67   :  { %v728_v41 = vmul.f32 %v727_v31, %v1244_v3  ;;  %v738_v34 = vmul.f32 %v1253_v4, %v737_v32  ;;  %v124_v44 = vadd.f32 %v123_v30, %v110_v29  ;;  %v137_v45 = vmul.f32 %v1283_v9, %v136_v36 }
  0x68   :  { %v856_v57 = vcombine.high %v855_v56, %v855_v56  ;;  %v749_v46 = vstv %s1606_s15  ;;  %v375_v47 = vadd.f32 %v374_v35, %v363_v33  ;;  %v386_v48 = vmul.f32 %v1292_v11, %v385_v37  ;;  %s1817_s15 = sld [smem:[#allocation9 + $0x1]] }
  0x69   :  { %624 = vrot.lane.b32.xlu0 %v623_v54, %s1184_s25  ;;  %v150_v49 = vstv %s1610_s17  ;;  %v397_v50 = vstv %s1613_s20  ;;  %v551_v3 = vadd.f32 %v550_v39, %v539_v38  ;;  %v562_v4 = vmul.f32 %v1267_v6, %v561_v40  ;;  %s1819_s17 = sld [smem:[#allocation9 + $0x8]]  ;;  %s1825_s20 = sld [smem:[#allocation9 + $0x4]] }
  0x6a   :  { %859 = vrot.lane.b32.xlu1 %v856_v57, %s1185_s16  ;;  %v573_v51 = vstv %s1618_s21  ;;  %v739_v52 = vadd.f32 %v738_v34, %v728_v41  ;;  %v750_v53 = vmul.f32 %v1258_v5, %v749_v46  ;;  %v138_v54 = vadd.f32 %v137_v45, %v124_v44  ;;  %s1835_s21 = sld [smem:[#allocation9 + $0x5]] }
  0x6b   :  { %v151_v55 = vmul.f32 %v1292_v11, %v150_v49  ;;  %v398_v57 = vmul.f32 %v1310_v19, %v397_v50  ;;  %v164_v7 = vstv %s1627_s24  ;;  %v409_v60 = vstv %s1630_s5  ;;  %s1839_s24 = sld [smem:[#allocation9 + $0xa]]  ;;  %s1843_s5 = sld [smem:[#allocation9 + $0xb]] }
  0x6c   :  { %v563_v61 = vadd.f32 %v562_v4, %v551_v3  ;;  %v574_v5 = vmul.f32 %v1283_v9, %v573_v51  ;;  %v585_v62 = vstv %s1634_s19  ;;  %v751_v63 = vadd.f32 %v750_v53, %v739_v52  ;;  %s1845_s19 = sld [smem:[#allocation9 + $0x6]] }
  0x6d   :  { %824 = vrot.lane.b32.xlu0 %v823_v42, %s1184_s25  ;;  %v387_v42 = vadd.f32 %v386_v48, %v375_v47  ;;  %v152_v2 = vadd.f32 %v151_v55, %v138_v54  ;;  %v165_v10 = vmul.f32 %v1310_v19, %v164_v7  ;;  %v773_v12 = vstv %s1642_s22 }
  0x6e   :  { %v410_v14 = vmul.f32 %v1324_v23, %v409_v60  ;;  %v178_v15 = vstv %s1646_s23  ;;  %v575_v16 = vadd.f32 %v574_v5, %v563_v61  ;;  %v586_v17 = vmul.f32 %v1292_v11, %v585_v62 }
  0x6f   :  { %v399_v13 = vadd.f32 %v398_v57, %v387_v42  ;;  %v597_v18 = vstv %s1651_s26  ;;  %v774_v22 = vmul.f32 %v1283_v9, %v773_v12  ;;  %v166_v24 = vadd.f32 %v165_v10, %v152_v2  ;;  %s1854_s26 = sld [smem:[#allocation9 + $0x7]] }
  0x70   :  { %v179_v25 = vmul.f32 %v1324_v23, %v178_v15  ;;  %v785_v26 = vstv %s1656_s27  ;;  %v1688_v29 = vand.u32 127, %v68_v0  ;;  %v587_v30 = vadd.f32 %v586_v17, %v575_v16 }
  0x71   :  { %857 = vrot.lane.b32.xlu0 %v855_v56, %s1185_s16  ;;  %v761_v56 = vstv %s1623_s18  ;;  %v411_v28 = vadd.f32 %v410_v14, %v399_v13  ;;  %v598_v31 = vmul.f32 %v1310_v19, %v597_v18  ;;  %v609_v9 = vstv %s1667_s28  ;;  %s1837_s18 = sld [smem:[#allocation9 + $0x3]] }
  0x72   :  { %v762_v1 = vmul.f32 %v1267_v6, %v761_v56  ;;  %v786_v33 = vmul.f32 %v1292_v11, %v785_v26  ;;  %v180_v36 = vadd.f32 %v179_v25, %v166_v24  ;;  %v797_v37 = vstv %s1672_s30 }
  0x73   :  { %v442_v38 = vrot.slane %v411_v28, %v1313_v20  ;;  %vm71_vm1 = vcmp.ne.s32.totalorder %v1688_v29, 0  ;;  %v599_v40 = vadd.f32 %v598_v31, %v587_v30  ;;  %v610_v41 = vmul.f32 %v1324_v23, %v609_v9 }
  0x74   :  { %v763_v21 = vadd.f32 %v762_v1, %v751_v63  ;;  %v798_v11 = vmul.f32 %v1310_v19, %v797_v37  ;;  %v1703_v45 = vadd.s32 128, %v1688_v29  ;;  %v216_v46 = vrot.slane %v180_v36, %v1313_v20 }
  0x75   :  { %v809_v47 = vstv %s1685_s0  ;;  %v443_v48 = vcombine.high %v442_v38, %v442_v38  ;;  %v611_v3 = vadd.f32 %v610_v41, %v599_v40  ;;  %v471_v57 = vstv %s1695_s29 }
  0x76   :  { %v775_v32 = vadd.f32 %v774_v22, %v763_v21  ;;  %v810_v19 = vmul.f32 %v1324_v23, %v809_v47  ;;  %vm74_vm3 = vcmp.ne.s32.totalorder %v1703_v45, 255  ;;  %v217_v53 = vcombine.high %v216_v46, %v216_v46 }
  0x77   :  { %v642_v60 = vrot.slane %v611_v3, %v1313_v20  ;;  %v250_v22 = vstv %s1712_s9 }
  0x78   :  { %v787_v34 = vadd.f32 %v786_v33, %v775_v32 }
  0x79   :  { %v643_v16 = vcombine.high %v642_v60, %v642_v60 }
  0x7a   :  { %v799_v4 = vadd.f32 %v798_v11, %v787_v34 }
  0x7c   :  { %v811_v5 = vadd.f32 %v810_v19, %v799_v4 }
  0x7e   :  { %v842_v21 = vrot.slane %v811_v5, %v1313_v20 }
  0x80   :  { %v843_v11 = vcombine.high %v842_v21, %v842_v21 }
  0xb1   :  { %v1638_v43 = vpop.permute.xlu1 %427 }
  0xb5   :  { %v1660_v58 = vpop.permute.xlu0 %196 }
  0xbb   :  { %v1662_v59 = vpop.permute.xlu1 %627 }
  0xc0   :  { %v1679_v6 = vpop.permute.xlu0 %231 }
  0xc7   :  { %v1681_v27 = vpop.permute.xlu1 %827 }
  0xcb   :  { %v425_v35 = vpop.permute.xlu1 %424 }
  0xcc   :  { %v432_v0 = vsel %vm198_vm0, %v425_v35, %v1638_v43  ;;  %v429_v50 = vsel %vm198_vm0, %v1638_v43, %v425_v35 }
  0xcd   :  { %v458_v39 = vpop.permute.xlu0 %457  ;;  %v433_v49 = vsel %vm71_vm1, %v432_v0, 0.0  ;;  %v447_v55 = vadd.f32 %v443_v48, %v429_v50 }
  0xce   :  { %v446_v51 = vadd.f32 %v442_v38, %v433_v49 }
  0xcf   :  { %v234_v44 = vpop.permute.xlu1 %233 }
  0xd0   :  { %v240_v43 = vsel %vm235_vm2, %v234_v44, %v1679_v6  ;;  %v236_v25 = vsel %vm235_vm2, %v1679_v6, %v234_v44 }
  0xd1   :  { %v246_v2 = vsel %vm74_vm3, %v240_v43, 0.0 }
  0xd3   :  { %v658_v52 = vpop.permute.xlu0 %657  ;;  %v460_v54 = vpop.permute.xlu1 %459 }
  0xd4   :  { %v461_v56 = vsel %vm235_vm2, %v458_v39, %v460_v54  ;;  %v465_v42 = vsel %vm235_vm2, %v460_v54, %v458_v39  ;;  %v671_v39 = vstv %s1723_s10 }
  0xd5   :  { %v467_v23 = vsel %vm74_vm3, %v465_v42, 0.0  ;;  %v468_v7 = vadd.f32 %v461_v56, %v446_v51 }
  0xd6   :  { %v469_v61 = vadd.f32 %v467_v23, %v447_v55 }
  0xd7   :  { %v194_v62 = vpop.permute.xlu0 %193  ;;  %v660_v63 = vpop.permute.xlu1 %659  ;;  %v1725_v1 = vadd.f32 %v471_v57, %v468_v7 }
  0xd8   :  { %v199_v10 = vsel %vm198_vm0, %v1660_v58, %v194_v62  ;;  %v202_v12 = vsel %vm198_vm0, %v194_v62, %v1660_v58  ;;  %v665_v13 = vsel %vm235_vm2, %v660_v63, %v658_v52  ;;  %v473_v17 = vadd.f32 %v471_v57, %v469_v61 }
  0xd9   :  { %v207_v14 = vsel %vm71_vm1, %v202_v12, 0.0  ;;  %v221_v15 = vadd.f32 %v217_v53, %v199_v10  ;;  %v474_v24 = vsel %vm253_vm4, %v1725_v1, 0.0  ;;  %v667_v28 = vsel %vm74_vm3, %v665_v13, 0.0 }
  0xda   :  { %v220_v18 = vadd.f32 %v216_v46, %v207_v14  ;;  %v475_v30 = vsel %vm253_vm4, %v473_v17, 0.0  ;;  %v661_v35 = vsel %vm235_vm2, %v658_v52, %v660_v63  ;;  %v871_v52 = vstv %s1745_s11 }
  0xdb   :  { %v248_v26 = vadd.f32 %v246_v2, %v221_v15  ;;  %v625_v58 = vpop.permute.xlu0 %624  ;;  %v476_v32 = vadd.f32 %v475_v30, %v474_v24 }
  0xdc   :  { %v247_v31 = vadd.f32 %v236_v25, %v220_v18  ;;  %v629_v20 = vsel %vm198_vm0, %v1662_v59, %v625_v58  ;;  %v632_v9 = vsel %vm198_vm0, %v625_v58, %v1662_v59  ;;  %v860_v48 = vpop.permute.xlu1 %859 }
  0xdd   :  { %v633_v6 = vsel %vm71_vm1, %v632_v9, 0.0  ;;  %v647_v33 = vadd.f32 %v643_v16, %v629_v20  ;;  %v252_v36 = vadd.f32 %v250_v22, %v248_v26  ;;  %477 = vadd.xlane.f32.xlu1 %v476_v32 }
  0xde   :  { %v646_v37 = vadd.f32 %v642_v60, %v633_v6  ;;  %v251_v38 = vadd.f32 %v250_v22, %v247_v31 }
  0xdf   :  { %v669_v0 = vadd.f32 %v667_v28, %v647_v33  ;;  %v825_v40 = vpop.permute.xlu0 %824  ;;  %v255_v41 = vsel %vm253_vm4, %v252_v36, 0.0 }
  0xe0   :  { %v668_v34 = vadd.f32 %v661_v35, %v646_v37  ;;  %v832_v59 = vsel %vm198_vm0, %v825_v40, %v1681_v27  ;;  %v254_v44 = vsel %vm253_vm4, %v251_v38, 0.0  ;;  %v829_v46 = vsel %vm198_vm0, %v1681_v27, %v825_v40 }
  0xe1   :  { %v833_v47 = vsel %vm71_vm1, %v832_v59, 0.0  ;;  %v256_v49 = vadd.f32 %v255_v41, %v254_v44  ;;  %v673_v50 = vadd.f32 %v671_v39, %v669_v0  ;;  %v847_v53 = vadd.f32 %v843_v11, %v829_v46 }
  0xe2   :  { %v846_v3 = vadd.f32 %v842_v21, %v833_v47  ;;  %v672_v4 = vadd.f32 %v671_v39, %v668_v34 }
  0xe3   :  { %v858_v19 = vpop.permute.xlu0 %857  ;;  %257 = vadd.xlane.f32.xlu0 %v256_v49  ;;  %v675_v51 = vsel %vm253_vm4, %v673_v50, 0.0 }
  0xe4   :  { %v861_v54 = vsel %vm235_vm2, %v858_v19, %v860_v48  ;;  %v865_v55 = vsel %vm235_vm2, %v860_v48, %v858_v19  ;;  %v674_v27 = vsel %vm253_vm4, %v672_v4, 0.0  ;;  %v275_v19 = vld [vmem:[%s1932_s1] sm:$0x3]  ;;  %s1823_s1 = sld [smem:[#allocation9 + $0x9]] }
  0xe5   :  { %v867_v56 = vsel %vm74_vm3, %v865_v55, 0.0  ;;  %v868_v42 = vadd.f32 %v861_v54, %v846_v3  ;;  %v676_v57 = vadd.f32 %v675_v51, %v674_v27  ;;  %v283_v51 = vsub.s32 1, %v1274_v8 }
  0xe6   :  { %v869_v43 = vadd.f32 %v867_v56, %v847_v53  ;;  %v289_v53 = vld [vmem:[%s1933_s2] sm:$0x3]  ;;  %s1833_s2 = sld [smem:[#allocation9 + $0x2]] }
  0xe7   :  { %677 = vadd.xlane.f32.xlu0 %v676_v57  ;;  %v872_v23 = vadd.f32 %v871_v52, %v868_v42  ;;  %v1821_v56 = vrot.slane %v275_v19, %v283_v51 }
  0xe8   :  { %v873_v7 = vadd.f32 %v871_v52, %v869_v43 }
  0xe9   :  { %v874_v60 = vsel %vm253_vm4, %v872_v23, 0.0 }
  0xea   :  { %v875_v61 = vsel %vm253_vm4, %v873_v7, 0.0 }
  0xeb   :  { %v876_v5 = vadd.f32 %v875_v61, %v874_v60 }
  0xed   :  { %877 = vadd.xlane.f32.xlu0 %v876_v5 }
 0x16a   :  { %v478_v62 = vpop.xlane.xlu1 %477 }
 0x16b   :  { %v479_v63 = vmul.f32 0.00390625, %v478_v62 }
 0x16d   :  { %v480_v2 = vsub.f32 %v1725_v1, %v479_v63  ;;  %v481_v10 = vsub.f32 %v473_v17, %v479_v63 }
 0x16f   :  { %v482_v13 = vmul.f32 %v480_v2, %v480_v2  ;;  %v483_v14 = vmul.f32 %v481_v10, %v481_v10 }
 0x170   :  { %v258_v12 = vpop.xlane.xlu0 %257 }
 0x171   :  { %v260_v15 = vmul.f32 0.00390625, %v258_v12  ;;  %v484_v16 = vsel %vm253_vm4, %v482_v13, 0.0  ;;  %v485_v18 = vsel %vm253_vm4, %v483_v14, 0.0  ;;  %v1852_v12 = vstv %s1937_s6 }
 0x172   :  { %v486_v24 = vadd.f32 %v485_v18, %v484_v16  ;;  %v313_v13 = vstv %s1813_s14 }
 0x173   :  { %v1775_v21 = vsub.f32 %v251_v38, %v260_v15  ;;  %v1777_v22 = vsub.f32 %v252_v36, %v260_v15 }
 0x174   :  { %v678_v25 = vpop.xlane.xlu0 %677  ;;  %487 = vadd.xlane.f32.xlu0 %v486_v24  ;;  %v319_v24 = vstv %s1819_s17 }
 0x175   :  { %v679_v26 = vmul.f32 0.00390625, %v678_v25  ;;  %v263_v58 = vmul.f32 %v1775_v21, %v1775_v21  ;;  %v264_v1 = vmul.f32 %v1777_v22, %v1777_v22  ;;  %v517_v25 = vstv %s1823_s1 }
 0x177   :  { %v1783_v17 = vsub.f32 %v672_v4, %v679_v26  ;;  %v1785_v28 = vsub.f32 %v673_v50, %v679_v26  ;;  %v265_v30 = vsel %vm253_vm4, %v263_v58, 0.0  ;;  %v266_v31 = vsel %vm253_vm4, %v264_v1, 0.0 }
 0x178   :  { %v267_v20 = vadd.f32 %v266_v31, %v265_v30  ;;  %v279_v4 = vsub.s32 0, %v1274_v8  ;;  %v316_v26 = vstv %s1825_s20 }
 0x179   :  { %v682_v9 = vmul.f32 %v1783_v17, %v1783_v17  ;;  %v683_v32 = vmul.f32 %v1785_v28, %v1785_v28 }
 0x17a   :  { %268 = vadd.xlane.f32.xlu1 %v267_v20  ;;  %v878_v6 = vpop.xlane.xlu0 %877  ;;  %v1815_v55 = vrot.slane %v275_v19, %v279_v4  ;;  %v1827_v43 = vrot.slane %v289_v53, %v279_v4 }
 0x17b   :  { %v879_v33 = vmul.f32 0.00390625, %v878_v6  ;;  %v684_v35 = vsel %vm253_vm4, %v682_v9, 0.0  ;;  %v685_v36 = vsel %vm253_vm4, %v683_v32, 0.0  ;;  %v707_v9 = vstv %s1833_s2 }
 0x17c   :  { %v686_v37 = vadd.f32 %v685_v36, %v684_v35  ;;  %v512_v6 = vstv %s1835_s21 }
 0x17d   :  { %v1795_v38 = vsub.f32 %v872_v23, %v879_v33  ;;  %v1797_v39 = vsub.f32 %v873_v7, %v879_v33  ;;  %v1829_v23 = vrot.slane %v289_v53, %v283_v51 }
 0x17e   :  { %687 = vadd.xlane.f32.xlu1 %v686_v37  ;;  %v907_v37 = vstv %s1837_s18 }
 0x17f   :  { %v882_v0 = vmul.f32 %v1795_v38, %v1795_v38  ;;  %v883_v40 = vmul.f32 %v1797_v39, %v1797_v39 }
 0x181   :  { %v884_v41 = vsel %vm253_vm4, %v882_v0, 0.0  ;;  %v885_v34 = vsel %vm253_vm4, %v883_v40, 0.0  ;;  %v717_v0 = vstv %s1839_s24  ;;  %v917_v40 = vstv %s1843_s5 }
 0x182   :  { %v886_v11 = vadd.f32 %v885_v34, %v884_v41  ;;  %v712_v41 = vstv %s1845_s19 }
 0x184   :  { %887 = vadd.xlane.f32.xlu0 %v886_v11  ;;  %v912_v11 = vstv %s1854_s26 }
 0x201   :  { %v488_v59 = vpop.xlane.xlu0 %487 }
 0x202   :  { %v489_v44 = vmul.f32 0.00390625, %v488_v59 }
 0x204   :  { %v490_v46 = vadd.f32 1e-05, %v489_v44 }
 0x206   :  { %1108 = vrsqrt.f32 %v490_v46 }
 0x207   :  { %v269_v47 = vpop.xlane.xlu1 %268 }
 0x208   :  { %v270_v48 = vmul.f32 0.00390625, %v269_v47 }
 0x20a   :  { %v271_v49 = vadd.f32 1e-05, %v270_v48 }
 0x20b   :  { %v688_v50 = vpop.xlane.xlu1 %687 }
 0x20c   :  { %1110 = vrsqrt.f32 %v271_v49  ;;  %v689_v3 = vmul.f32 0.00390625, %v688_v50 }
 0x20e   :  { %v690_v52 = vadd.f32 1e-05, %v689_v3 }
 0x210   :  { %1112 = vrsqrt.f32 %v690_v52  ;;  %v1109_v54 = vpop.eup %1108 }
 0x211   :  { %v888_v27 = vpop.xlane.xlu0 %887  ;;  %v492_v42 = vmul.f32 %v1109_v54, %v480_v2  ;;  %v493_v8 = vmul.f32 %v1109_v54, %v481_v10 }
 0x212   :  { %v889_v57 = vmul.f32 0.00390625, %v888_v27 }
 0x213   :  { %v494_v7 = vmul.f32 %v492_v42, %v1815_v55  ;;  %v495_v60 = vmul.f32 %v493_v8, %v1821_v56 }
 0x214   :  { %v890_v61 = vadd.f32 1e-05, %v889_v57 }
 0x215   :  { %v496_v62 = vadd.f32 %v494_v7, %v1827_v43  ;;  %v497_v63 = vadd.f32 %v495_v60, %v1829_v23 }
 0x216   :  { %v1111_v5 = vpop.eup %1110  ;;  %1114 = vrsqrt.f32 %v890_v61 }
 0x217   :  { %v273_v2 = vmul.f32 %v1111_v5, %v1775_v21  ;;  %v274_v10 = vmul.f32 %v1111_v5, %v1777_v22  ;;  %v501_v14 = vmul.f32 %v497_v63, %v1852_v12  ;;  %v500_v15 = vmul.f32 %v496_v62, %v1852_v12 }
 0x218   :  { %vm499_vm5 = vcmp.gt.f32.partialorder %v497_v63, 0.0  ;;  %vm498_vm6 = vcmp.gt.f32.partialorder %v496_v62, 0.0  ;;  %v507_v22 = vstv %s1817_s15 }
 0x219   :  { %v287_v16 = vmul.f32 %v1815_v55, %v273_v2  ;;  %v288_v18 = vmul.f32 %v1821_v56, %v274_v10  ;;  %v503_v20 = vsel %vm499_vm5, %v497_v63, %v501_v14  ;;  %v502_v32 = vsel %vm498_vm6, %v496_v62, %v500_v15 }
 0x21a   :  { %v1113_v21 = vpop.eup %1112  ;;  %v509_v46 = vmul.f32 %v507_v22, %v503_v20  ;;  %v508_v47 = vmul.f32 %v507_v22, %v502_v32  ;;  %v518_v4 = vmul.f32 %v517_v25, %v502_v32  ;;  %v519_v19 = vmul.f32 %v517_v25, %v503_v20 }
 0x21b   :  { %v301_v58 = vadd.f32 %v1827_v43, %v287_v16  ;;  %v302_v1 = vadd.f32 %v1829_v23, %v288_v18  ;;  %v692_v30 = vmul.f32 %v1113_v21, %v1783_v17  ;;  %v693_v31 = vmul.f32 %v1113_v21, %v1785_v28 }
 0x21c   :  { %v513_v8 = vmul.f32 %v512_v6, %v502_v32  ;;  %v514_v60 = vmul.f32 %v512_v6, %v503_v20 }
 0x21d   :  { %v694_v33 = vmul.f32 %v692_v30, %v1815_v55  ;;  %v695_v35 = vmul.f32 %v693_v31, %v1821_v56  ;;  %vm304_vm7 = vcmp.gt.f32.partialorder %v302_v1, 0.0  ;;  %v307_v36 = vmul.f32 %v1852_v12, %v302_v1 }
 0x21e   :  { %v306_v28 = vmul.f32 %v1852_v12, %v301_v58  ;;  %vm303_vm8 = vcmp.gt.f32.partialorder %v301_v58, 0.0 }
 0x21f   :  { %v697_v17 = vadd.f32 %v695_v35, %v1829_v23  ;;  %v696_v34 = vadd.f32 %v694_v33, %v1827_v43  ;;  %v309_v44 = vsel %vm304_vm7, %v302_v1, %v307_v36 }
 0x220   :  { %v1115_v59 = vpop.eup %1114  ;;  %v308_v54 = vsel %vm303_vm8, %v301_v58, %v306_v28  ;;  %v315_v27 = vmul.f32 %v313_v13, %v309_v44  ;;  %v318_v7 = vmul.f32 %v316_v26, %v309_v44  ;;  %v321_v35 = vmul.f32 %v319_v24, %v309_v44 }
 0x221   :  { %v892_v48 = vmul.f32 %v1115_v59, %v1795_v38  ;;  %v893_v49 = vmul.f32 %v1115_v59, %v1797_v39  ;;  %vm699_vm9 = vcmp.gt.f32.partialorder %v697_v17, 0.0  ;;  %v701_v50 = vmul.f32 %v697_v17, %v1852_v12 }
 0x222   :  { %vm698_vm10 = vcmp.gt.f32.partialorder %v696_v34, 0.0  ;;  %v700_v3 = vmul.f32 %v696_v34, %v1852_v12  ;;  %v511_v61 = vadd.f32 %v509_v46, %v315_v27  ;;  %v314_v5 = vmul.f32 %v313_v13, %v308_v54 }
 0x223   :  { %v894_v51 = vmul.f32 %v892_v48, %v1815_v55  ;;  %v895_v52 = vmul.f32 %v893_v49, %v1821_v56  ;;  %v703_v53 = vsel %vm699_vm9, %v697_v17, %v701_v50  ;;  %v320_v62 = vmul.f32 %v319_v24, %v308_v54 }
 0x224   :  { %v709_v42 = vmul.f32 %v707_v9, %v703_v53  ;;  %v702_v38 = vsel %vm698_vm10, %v696_v34, %v700_v3  ;;  %v317_v55 = vmul.f32 %v316_v26, %v308_v54  ;;  %v510_v10 = vadd.f32 %v508_v47, %v314_v5 }
 0x225   :  { %v897_v39 = vadd.f32 %v895_v52, %v1829_v23  ;;  %v896_v57 = vadd.f32 %v894_v51, %v1827_v43  ;;  %v708_v63 = vmul.f32 %v707_v9, %v702_v38  ;;  %v516_v15 = vadd.f32 %v514_v60, %v318_v7 }
 0x226   :  { %v711_v2 = vadd.f32 %v709_v42, %v511_v61  ;;  %v515_v23 = vadd.f32 %v513_v8, %v317_v55  ;;  %v713_v16 = vmul.f32 %v712_v41, %v702_v38  ;;  %v714_v18 = vmul.f32 %v712_v41, %v703_v53 }
 0x227   :  { %vm899_vm11 = vcmp.gt.f32.partialorder %v897_v39, 0.0  ;;  %v901_v56 = vmul.f32 %v897_v39, %v1852_v12  ;;  %vm898_vm12 = vcmp.gt.f32.partialorder %v896_v57, 0.0  ;;  %v900_v14 = vmul.f32 %v896_v57, %v1852_v12 }
 0x228   :  { %v718_v22 = vmul.f32 %v717_v0, %v702_v38  ;;  %v710_v26 = vadd.f32 %v708_v63, %v510_v10  ;;  %v715_v1 = vadd.f32 %v713_v16, %v515_v23  ;;  %v716_v30 = vadd.f32 %v714_v18, %v516_v15 }
 0x229   :  { %v903_v43 = vsel %vm899_vm11, %v897_v39, %v901_v56  ;;  %v902_v21 = vsel %vm898_vm12, %v896_v57, %v900_v14  ;;  %v520_v12 = vadd.f32 %v518_v4, %v320_v62  ;;  %v719_v36 = vmul.f32 %v717_v0, %v703_v53 }
 0x22a   :  { %v909_v13 = vmul.f32 %v907_v37, %v903_v43  ;;  %v914_v25 = vmul.f32 %v912_v11, %v903_v43  ;;  %v908_v58 = vmul.f32 %v907_v37, %v902_v21  ;;  %v918_v20 = vmul.f32 %v917_v40, %v902_v21 }
 0x22b   :  { %v913_v9 = vmul.f32 %v912_v11, %v902_v21  ;;  %v720_v33 = vadd.f32 %v718_v22, %v520_v12  ;;  %v521_v17 = vadd.f32 %v519_v19, %v321_v35  ;;  %v919_v28 = vmul.f32 %v917_v40, %v903_v43 }
 0x22c   :  { %v911_v31 = vadd.f32 %v909_v13, %v711_v2  ;;  %v910_v32 = vadd.f32 %v908_v58, %v710_v26  ;;  %v916_v6 = vadd.f32 %v914_v25, %v716_v30  ;;  %v953_v4 = vstv %s1938_s7 }
 0x22d   :  { %v915_v41 = vadd.f32 %v913_v9, %v715_v1  ;;  %v920_v37 = vadd.f32 %v918_v20, %v720_v33  ;;  %v721_v34 = vadd.f32 %v719_v36, %v521_v17 }
 0x22e   :  { %923 = vrot.lane.b32.xlu1 %v911_v31, %s1184_s25  ;;  %927 = vrot.lane.b32.xlu0 %v910_v32, %s1184_s25 }
 0x22f   :  { %v921_v11 = vadd.f32 %v919_v28, %v721_v34 }
 0x232   :  { %939 = vrot.lane.b32.xlu1 %v920_v37, %s1185_s16 }
 0x236   :  { %941 = vrot.lane.b32.xlu1 %v921_v11, %s1185_s16  ;;  %s1186_s16 = smov [#allocation10]  }
 0x237   :  { %s974_s27 = sshll.u32 %s1186_s16, 4  ;;  %s975_s27 = int_to_ptr.vmem [resolvable:$true] %s974_s27 }
 0x238   :  { %s1152_s28 = scalar_lea.vmem %s975_s27, 64  ;;  %p1157_p2 = scmp.lt.s32.totalorder %s975_s27, %s975_s27 }
 0x239   :  { %p1153_p1 = scmp.ne.s32.totalorder %s975_s27, %s1152_s28  ;;  %p1158_p3 = scmp.lt.s32.totalorder %s1152_s28, %s1152_s28 }
 0x23b   :  { %p1159_p4 = por %p1158_p3, %p1157_p2 }
 0x23d   :  { %p1160_p5 = pnand %p1159_p4, %p1153_p1 }
 0x2a0   :  { %v924_v59 = vpop.permute.xlu1 %923  ;;  %v928_v46 = vpop.permute.xlu0 %927 }
 0x2a1   :  { %v932_v47 = vsel %vm198_vm0, %v924_v59, %v928_v46  ;;  %v929_v44 = vsel %vm198_vm0, %v928_v46, %v924_v59 }
 0x2a2   :  { %v933_v0 = vsel %vm71_vm1, %v932_v47, 0.0  ;;  %v936_v50 = vadd.f32 %v929_v44, %v916_v6 }
 0x2a3   :  { %v935_v48 = vadd.f32 %v933_v0, %v915_v41 }
 0x2a4   :  { %v940_v24 = vpop.permute.xlu1 %939 }
 0x2a8   :  { %v942_v49 = vpop.permute.xlu1 %941 }
 0x2a9   :  { %v943_v40 = vsel %vm235_vm2, %v940_v24, %v942_v49  ;;  %v947_v3 = vsel %vm235_vm2, %v942_v49, %v940_v24 }
 0x2aa   :  { %v949_v19 = vsel %vm74_vm3, %v947_v3, 0.0  ;;  %v950_v51 = vadd.f32 %v943_v40, %v935_v48 }
 0x2ab   :  { %v951_v52 = vadd.f32 %v949_v19, %v936_v50 }
 0x2ac   :  { %v954_v29 = vadd.f32 %v953_v4, %v950_v51 }
 0x2ad   :  { %v955_v53 = vadd.f32 %v953_v4, %v951_v52 }
 0x2af   :  { %v958_v54 = vcombine.low %v954_v29, %v955_v53 }
 0x2b1   :  { %1100 = vst.sshfl [vmem:[#allocation10] sm:$0x33 pattern:$0x76325410] %v958_v54 }
 0x2b2   :  { %1163 = shalt.err (!%p1160_p5)
}
 0x2b3   :  { %s1164_s0 = scalar_lea.hbm %s1939_s8, 64 }
 0x2b4   :  { %p1165_p6 = scmp.ne.s32.totalorder %s1939_s8, %s1164_s0  ;;  %p1168_p7 = scmp.lt.u32.totalorder %s1164_s0, %s1939_s8 }
 0x2b6   :  { %p1170_p8 = pnand %p1168_p7, %p1165_p6 }
 0x2b8   :  { %1173 = shalt.err (!%p1170_p8)
}
 0x2b9   :  { %977 = dma.vmem_to_hbm [thread:$0]  %s975_s27, 64, %s1939_s8, [#allocation5]  }
 0x2ba   :  { %1178 = dma.done.wait [#allocation5], 64  }
 0x2bb   :  { %1179 = vsyncadd [#allocation5], 4294967232 }
 0x2bc   :  { %981 = vsyncpa [#allocation5], 1 }
 0x2bd   :  { %982 = vsyncpa [#allocation6], 1 }
 0x2be   :  { %983 = vsyncpa [#allocation8], 1 }

</bundles_post_ra>
